<compile_context>
chip_gen: v5e
topology: v5e:2x2
jax: 0.10.0
libtpu: 0.0.40
codegen_flags: <defaults>
</compile_context>

<pallas_src>
import jax
import jax.numpy as jnp
from jax.experimental import pallas as pl
from jax.experimental.pallas import tpu as pltpu


def _lstm_predictor_kernel(x_ref, w_ref, b_ref, out_ref):
    """Single-shot LSTM encoder + autoregressive rollout.

    x_ref   : (B, T, H)   float32, full sequence, VMEM resident
    w_ref   : (2H, 4H)    fused [W_ih; W_hh] (columns ordered i, f, o, g)
    b_ref   : (1, 4H)     fused bias (same column order)
    out_ref : (B, S, H)   S = 1 + n_steps
    """
    B, T, H = x_ref.shape
    S = out_ref.shape[1]
    n_steps = S - 1
    G = 4 * H

    # Hoisted once (JAX does not CSE broadcast_in_dim inside the unrolled loop).
    w = w_ref[...]                                       # (2H, 4H)
    bias = jnp.broadcast_to(b_ref[...], (B, G))          # (B, 4H)

    def cell(xin, h, c):
        # One fused MXU matmul: [x | h] @ [[W_ih^T]; [W_hh^T]]
        xh = jnp.concatenate([xin, h], axis=-1)          # (B, 2H)
        gates = jnp.dot(xh, w, preferred_element_type=jnp.float32) + bias
        # Columns are ordered (i, f, o, g): one sigmoid pass over the first
        # 3H lanes, one tanh pass over the last H lanes.
        sig = jax.nn.sigmoid(gates[:, : 3 * H])          # [i | f | o]
        g = jnp.tanh(gates[:, 3 * H:])                   # cell candidate
        i_g = sig[:, :H]
        f_g = sig[:, H: 2 * H]
        o_g = sig[:, 2 * H: 3 * H]
        c_new = f_g * c + i_g * g
        h_new = o_g * jnp.tanh(c_new)
        return h_new, c_new

    h = jnp.zeros((B, H), jnp.float32)
    c = jnp.zeros((B, H), jnp.float32)

    # ---- encoder phase (unrolled; T is a compile-time constant) ----
    for t in range(T):
        xin = x_ref[:, t, :].astype(jnp.float32)         # static slice
        h, c = cell(xin, h, c)

    # Write the encoder's final hidden state exactly once (slot 0).
    out_ref[:, 0, :] = h.astype(out_ref.dtype)

    # ---- autoregressive phase: feed h back as the next input ----
    for k in range(n_steps):
        h, c = cell(h, h, c)
        out_ref[:, k + 1, :] = h.astype(out_ref.dtype)


def predictor_block_pallas(x0, n_steps, w_ih, w_hh, b_ih, b_hh):
    """x0: (B, T, H) batch-first (PyTorch convention). n_steps: python int."""
    B, T, H = x0.shape
    assert T >= 1, "encoder needs at least one time step"
    assert w_ih.shape == (4 * H, H) and w_hh.shape == (4 * H, H)
    n_steps = int(n_steps)
    S = 1 + n_steps

    def _reorder(a):
        # PyTorch gate order (i, f, g, o) -> kernel order (i, f, o, g) so the
        # three sigmoid gates are lane-contiguous.
        i, f, g, o = jnp.split(a, 4, axis=0)
        return jnp.concatenate([i, f, o, g], axis=0)

    # One-time weight prep: fused (2H, 4H) matrix, columns in (i, f, o, g).
    w_fused = jnp.concatenate(
        [_reorder(w_ih).T, _reorder(w_hh).T], axis=0
    ).astype(jnp.float32)                                 # (2H, 4H)
    bias = _reorder((b_ih + b_hh).astype(jnp.float32)).reshape(1, 4 * H)

    out = pl.pallas_call(
        _lstm_predictor_kernel,
        out_shape=jax.ShapeDtypeStruct((B, S, H), jnp.float32),
        grid_spec=pltpu.PrefetchScalarGridSpec(
            num_scalar_prefetch=0,
            grid=(1,),  # single invocation; recurrence is fully in-kernel
            in_specs=[
                pl.BlockSpec((B, T, H), lambda i: (0, 0, 0)),
                pl.BlockSpec((2 * H, 4 * H), lambda i: (0, 0)),
                pl.BlockSpec((1, 4 * H), lambda i: (0, 0)),
            ],
            out_specs=pl.BlockSpec((B, S, H), lambda i: (0, 0, 0)),
        ),
        compiler_params=pltpu.CompilerParams(
            dimension_semantics=("arbitrary",)),
    )(x0.astype(jnp.float32), w_fused, bias)

    return out                                            # (B, 1 + n_steps, H)


# ---------------- pure-JAX reference (for correctness check) ----------------
def _lstm_cell_ref(h, c, x, w_ih, w_hh, b_ih, b_hh):
    gates = x @ w_ih.T + b_ih + h @ w_hh.T + b_hh
    i, f, g, o = jnp.split(gates, 4, axis=-1)             # PyTorch gate order
    i, f, o = jax.nn.sigmoid(i), jax.nn.sigmoid(f), jax.nn.sigmoid(o)
    g = jnp.tanh(g)
    c = f * c + i * g
    h = o * jnp.tanh(c)
    return h, c


def predictor_block_ref(x0, n_steps, w_ih, w_hh, b_ih, b_hh):
    B, T, H = x0.shape
    h = jnp.zeros((B, H), jnp.float32)
    c = jnp.zeros((B, H), jnp.float32)
    for t in range(T):
        h, c = _lstm_cell_ref(h, c, x0[:, t, :], w_ih, w_hh, b_ih, b_hh)
    preds = [h]
    for _ in range(n_steps):
        h, c = _lstm_cell_ref(h, c, h, w_ih, w_hh, b_ih, b_hh)
        preds.append(h)
    return jnp.stack(preds, axis=1)


if __name__ == "__main__":
    B, T, H = 8, 8, 32          # hidden_size == input_size, per the module
    n_steps = 4

    key = jax.random.PRNGKey(0)
    kx, k1, k2, k3, k4 = jax.random.split(key, 5)
    bound = 1.0 / jnp.sqrt(H)   # PyTorch LSTM default init: U(-1/sqrt(H), 1/sqrt(H))
    x0 = jax.random.normal(kx, (B, T, H), jnp.float32)
    w_ih = jax.random.uniform(k1, (4 * H, H), jnp.float32, -bound, bound)
    w_hh = jax.random.uniform(k2, (4 * H, H), jnp.float32, -bound, bound)
    b_ih = jax.random.uniform(k3, (4 * H,), jnp.float32, -bound, bound)
    b_hh = jax.random.uniform(k4, (4 * H,), jnp.float32, -bound, bound)

    run = jax.jit(predictor_block_pallas, static_argnums=(1,))
    out = run(x0, n_steps, w_ih, w_hh, b_ih, b_hh)
    out = jax.block_until_ready(out)

    ref = predictor_block_ref(x0, n_steps, w_ih, w_hh, b_ih, b_hh)
    assert out.shape == (B, 1 + n_steps, H), out.shape
    # atol 1e-4: the fused (B,2H)x(2H,4H) MXU contraction reassociates the f32
    # sum vs. the two-matmul reference; observed error is ~1e-6 over 12 steps.
    assert jnp.allclose(out, ref, atol=1e-4, rtol=1e-4), \
        float(jnp.max(jnp.abs(out - ref)))

    print("KERNEL_OK")
</pallas_src>

<mosaic_0001>
module attributes {stable_mosaic.version = 11 : i64} {
  func.func @_lstm_predictor_kernel(%arg0: i32, %arg1: memref<8x8x32xf32, #tpu.memory_space<vmem>>, %arg2: memref<64x128xf32, #tpu.memory_space<vmem>>, %arg3: memref<1x128xf32, #tpu.memory_space<vmem>>, %arg4: memref<8x5x32xf32, #tpu.memory_space<vmem>>) attributes {dimension_semantics = [#tpu.dimension_semantics<arbitrary>], iteration_bounds = array<i64: 1>, scalar_prefetch = 0 : i64, scratch_operands = 0 : i64, tpu.core_type = #tpu.core_type<tc>, window_params = [{pipeline_mode = #tpu.pipeline_mode<synchronous>, transform_indices = @transform_0, window_bounds = array<i64: 8, 8, 32>}, {pipeline_mode = #tpu.pipeline_mode<synchronous>, transform_indices = @transform_1, window_bounds = array<i64: 64, 128>}, {pipeline_mode = #tpu.pipeline_mode<synchronous>, transform_indices = @transform_2, window_bounds = array<i64: 1, 128>}, {pipeline_mode = #tpu.pipeline_mode<synchronous>, transform_indices = @transform_3, window_bounds = array<i64: 8, 5, 32>}]} {
    %c0 = arith.constant 0 : index
    %c0_0 = arith.constant 0 : index
    %0 = vector.load %arg2[%c0, %c0_0] : memref<64x128xf32, #tpu.memory_space<vmem>>, vector<64x128xf32>
    %c0_1 = arith.constant 0 : index
    %c0_2 = arith.constant 0 : index
    %1 = vector.load %arg3[%c0_1, %c0_2] : memref<1x128xf32, #tpu.memory_space<vmem>>, vector<1x128xf32>
    %2 = vector.shape_cast %1 : vector<1x128xf32> to vector<1x128xf32>
    %3 = vector.broadcast %2 : vector<1x128xf32> to vector<8x128xf32>
    %cst = arith.constant 0.000000e+00 : f32
    %4 = vector.broadcast %cst : f32 to vector<8x32xf32>
    %cst_3 = arith.constant 0.000000e+00 : f32
    %5 = vector.broadcast %cst_3 : f32 to vector<8x32xf32>
    %c0_4 = arith.constant 0 : index
    %c0_5 = arith.constant 0 : index
    %c0_6 = arith.constant 0 : index
    %6 = vector.load %arg1[%c0_4, %c0_5, %c0_6] : memref<8x8x32xf32, #tpu.memory_space<vmem>>, vector<8x1x32xf32>
    %7 = vector.shape_cast %6 : vector<8x1x32xf32> to vector<8x32xf32>
    %8 = tpu.concatenate %7, %4 in 1 : vector<8x32xf32>, vector<8x32xf32> -> vector<8x64xf32>
    %cst_7 = arith.constant dense<0.000000e+00> : vector<8x128xf32>
    %9 = tpu.matmul %8, %0, %cst_7 {dimension_numbers = #tpu.dot_dimension_numbers<[1], [0], [0], [1], [0, 0, 1, 1], [], []>} : vector<8x64xf32>, vector<64x128xf32>, vector<8x128xf32> -> vector<8x128xf32>
    %10 = arith.addf %9, %3 : vector<8x128xf32>
    %11 = vector.extract_strided_slice %10 {offsets = [0, 0], sizes = [8, 96], strides = [1, 1]} : vector<8x128xf32> to vector<8x96xf32>
    %12 = arith.negf %11 : vector<8x96xf32>
    %13 = math.exp %12 : vector<8x96xf32>
    %cst_8 = arith.constant 1.000000e+00 : f32
    %14 = vector.broadcast %cst_8 : f32 to vector<8x96xf32>
    %15 = arith.addf %14, %13 : vector<8x96xf32>
    %16 = arith.divf %14, %15 : vector<8x96xf32>
    %17 = vector.extract_strided_slice %10 {offsets = [0, 96], sizes = [8, 32], strides = [1, 1]} : vector<8x128xf32> to vector<8x32xf32>
    %18 = math.tanh %17 : vector<8x32xf32>
    %19 = vector.extract_strided_slice %16 {offsets = [0, 0], sizes = [8, 32], strides = [1, 1]} : vector<8x96xf32> to vector<8x32xf32>
    %20 = vector.extract_strided_slice %16 {offsets = [0, 32], sizes = [8, 32], strides = [1, 1]} : vector<8x96xf32> to vector<8x32xf32>
    %21 = vector.extract_strided_slice %16 {offsets = [0, 64], sizes = [8, 32], strides = [1, 1]} : vector<8x96xf32> to vector<8x32xf32>
    %22 = arith.mulf %20, %5 : vector<8x32xf32>
    %23 = arith.mulf %19, %18 : vector<8x32xf32>
    %24 = arith.addf %22, %23 : vector<8x32xf32>
    %25 = math.tanh %24 : vector<8x32xf32>
    %26 = arith.mulf %21, %25 : vector<8x32xf32>
    %c0_9 = arith.constant 0 : index
    %c1 = arith.constant 1 : index
    %c0_10 = arith.constant 0 : index
    %27 = vector.load %arg1[%c0_9, %c1, %c0_10] : memref<8x8x32xf32, #tpu.memory_space<vmem>>, vector<8x1x32xf32>
    %28 = vector.shape_cast %27 : vector<8x1x32xf32> to vector<8x32xf32>
    %29 = tpu.concatenate %28, %26 in 1 : vector<8x32xf32>, vector<8x32xf32> -> vector<8x64xf32>
    %cst_11 = arith.constant dense<0.000000e+00> : vector<8x128xf32>
    %30 = tpu.matmul %29, %0, %cst_11 {dimension_numbers = #tpu.dot_dimension_numbers<[1], [0], [0], [1], [0, 0, 1, 1], [], []>} : vector<8x64xf32>, vector<64x128xf32>, vector<8x128xf32> -> vector<8x128xf32>
    %31 = arith.addf %30, %3 : vector<8x128xf32>
    %32 = vector.extract_strided_slice %31 {offsets = [0, 0], sizes = [8, 96], strides = [1, 1]} : vector<8x128xf32> to vector<8x96xf32>
    %33 = arith.negf %32 : vector<8x96xf32>
    %34 = math.exp %33 : vector<8x96xf32>
    %cst_12 = arith.constant 1.000000e+00 : f32
    %35 = vector.broadcast %cst_12 : f32 to vector<8x96xf32>
    %36 = arith.addf %35, %34 : vector<8x96xf32>
    %37 = arith.divf %35, %36 : vector<8x96xf32>
    %38 = vector.extract_strided_slice %31 {offsets = [0, 96], sizes = [8, 32], strides = [1, 1]} : vector<8x128xf32> to vector<8x32xf32>
    %39 = math.tanh %38 : vector<8x32xf32>
    %40 = vector.extract_strided_slice %37 {offsets = [0, 0], sizes = [8, 32], strides = [1, 1]} : vector<8x96xf32> to vector<8x32xf32>
    %41 = vector.extract_strided_slice %37 {offsets = [0, 32], sizes = [8, 32], strides = [1, 1]} : vector<8x96xf32> to vector<8x32xf32>
    %42 = vector.extract_strided_slice %37 {offsets = [0, 64], sizes = [8, 32], strides = [1, 1]} : vector<8x96xf32> to vector<8x32xf32>
    %43 = arith.mulf %41, %24 : vector<8x32xf32>
    %44 = arith.mulf %40, %39 : vector<8x32xf32>
    %45 = arith.addf %43, %44 : vector<8x32xf32>
    %46 = math.tanh %45 : vector<8x32xf32>
    %47 = arith.mulf %42, %46 : vector<8x32xf32>
    %c0_13 = arith.constant 0 : index
    %c2 = arith.constant 2 : index
    %c0_14 = arith.constant 0 : index
    %48 = vector.load %arg1[%c0_13, %c2, %c0_14] : memref<8x8x32xf32, #tpu.memory_space<vmem>>, vector<8x1x32xf32>
    %49 = vector.shape_cast %48 : vector<8x1x32xf32> to vector<8x32xf32>
    %50 = tpu.concatenate %49, %47 in 1 : vector<8x32xf32>, vector<8x32xf32> -> vector<8x64xf32>
    %cst_15 = arith.constant dense<0.000000e+00> : vector<8x128xf32>
    %51 = tpu.matmul %50, %0, %cst_15 {dimension_numbers = #tpu.dot_dimension_numbers<[1], [0], [0], [1], [0, 0, 1, 1], [], []>} : vector<8x64xf32>, vector<64x128xf32>, vector<8x128xf32> -> vector<8x128xf32>
    %52 = arith.addf %51, %3 : vector<8x128xf32>
    %53 = vector.extract_strided_slice %52 {offsets = [0, 0], sizes = [8, 96], strides = [1, 1]} : vector<8x128xf32> to vector<8x96xf32>
    %54 = arith.negf %53 : vector<8x96xf32>
    %55 = math.exp %54 : vector<8x96xf32>
    %cst_16 = arith.constant 1.000000e+00 : f32
    %56 = vector.broadcast %cst_16 : f32 to vector<8x96xf32>
    %57 = arith.addf %56, %55 : vector<8x96xf32>
    %58 = arith.divf %56, %57 : vector<8x96xf32>
    %59 = vector.extract_strided_slice %52 {offsets = [0, 96], sizes = [8, 32], strides = [1, 1]} : vector<8x128xf32> to vector<8x32xf32>
    %60 = math.tanh %59 : vector<8x32xf32>
    %61 = vector.extract_strided_slice %58 {offsets = [0, 0], sizes = [8, 32], strides = [1, 1]} : vector<8x96xf32> to vector<8x32xf32>
    %62 = vector.extract_strided_slice %58 {offsets = [0, 32], sizes = [8, 32], strides = [1, 1]} : vector<8x96xf32> to vector<8x32xf32>
    %63 = vector.extract_strided_slice %58 {offsets = [0, 64], sizes = [8, 32], strides = [1, 1]} : vector<8x96xf32> to vector<8x32xf32>
    %64 = arith.mulf %62, %45 : vector<8x32xf32>
    %65 = arith.mulf %61, %60 : vector<8x32xf32>
    %66 = arith.addf %64, %65 : vector<8x32xf32>
    %67 = math.tanh %66 : vector<8x32xf32>
    %68 = arith.mulf %63, %67 : vector<8x32xf32>
    %c0_17 = arith.constant 0 : index
    %c3 = arith.constant 3 : index
    %c0_18 = arith.constant 0 : index
    %69 = vector.load %arg1[%c0_17, %c3, %c0_18] : memref<8x8x32xf32, #tpu.memory_space<vmem>>, vector<8x1x32xf32>
    %70 = vector.shape_cast %69 : vector<8x1x32xf32> to vector<8x32xf32>
    %71 = tpu.concatenate %70, %68 in 1 : vector<8x32xf32>, vector<8x32xf32> -> vector<8x64xf32>
    %cst_19 = arith.constant dense<0.000000e+00> : vector<8x128xf32>
    %72 = tpu.matmul %71, %0, %cst_19 {dimension_numbers = #tpu.dot_dimension_numbers<[1], [0], [0], [1], [0, 0, 1, 1], [], []>} : vector<8x64xf32>, vector<64x128xf32>, vector<8x128xf32> -> vector<8x128xf32>
    %73 = arith.addf %72, %3 : vector<8x128xf32>
    %74 = vector.extract_strided_slice %73 {offsets = [0, 0], sizes = [8, 96], strides = [1, 1]} : vector<8x128xf32> to vector<8x96xf32>
    %75 = arith.negf %74 : vector<8x96xf32>
    %76 = math.exp %75 : vector<8x96xf32>
    %cst_20 = arith.constant 1.000000e+00 : f32
    %77 = vector.broadcast %cst_20 : f32 to vector<8x96xf32>
    %78 = arith.addf %77, %76 : vector<8x96xf32>
    %79 = arith.divf %77, %78 : vector<8x96xf32>
    %80 = vector.extract_strided_slice %73 {offsets = [0, 96], sizes = [8, 32], strides = [1, 1]} : vector<8x128xf32> to vector<8x32xf32>
    %81 = math.tanh %80 : vector<8x32xf32>
    %82 = vector.extract_strided_slice %79 {offsets = [0, 0], sizes = [8, 32], strides = [1, 1]} : vector<8x96xf32> to vector<8x32xf32>
    %83 = vector.extract_strided_slice %79 {offsets = [0, 32], sizes = [8, 32], strides = [1, 1]} : vector<8x96xf32> to vector<8x32xf32>
    %84 = vector.extract_strided_slice %79 {offsets = [0, 64], sizes = [8, 32], strides = [1, 1]} : vector<8x96xf32> to vector<8x32xf32>
    %85 = arith.mulf %83, %66 : vector<8x32xf32>
    %86 = arith.mulf %82, %81 : vector<8x32xf32>
    %87 = arith.addf %85, %86 : vector<8x32xf32>
    %88 = math.tanh %87 : vector<8x32xf32>
    %89 = arith.mulf %84, %88 : vector<8x32xf32>
    %c0_21 = arith.constant 0 : index
    %c4 = arith.constant 4 : index
    %c0_22 = arith.constant 0 : index
    %90 = vector.load %arg1[%c0_21, %c4, %c0_22] : memref<8x8x32xf32, #tpu.memory_space<vmem>>, vector<8x1x32xf32>
    %91 = vector.shape_cast %90 : vector<8x1x32xf32> to vector<8x32xf32>
    %92 = tpu.concatenate %91, %89 in 1 : vector<8x32xf32>, vector<8x32xf32> -> vector<8x64xf32>
    %cst_23 = arith.constant dense<0.000000e+00> : vector<8x128xf32>
    %93 = tpu.matmul %92, %0, %cst_23 {dimension_numbers = #tpu.dot_dimension_numbers<[1], [0], [0], [1], [0, 0, 1, 1], [], []>} : vector<8x64xf32>, vector<64x128xf32>, vector<8x128xf32> -> vector<8x128xf32>
    %94 = arith.addf %93, %3 : vector<8x128xf32>
    %95 = vector.extract_strided_slice %94 {offsets = [0, 0], sizes = [8, 96], strides = [1, 1]} : vector<8x128xf32> to vector<8x96xf32>
    %96 = arith.negf %95 : vector<8x96xf32>
    %97 = math.exp %96 : vector<8x96xf32>
    %cst_24 = arith.constant 1.000000e+00 : f32
    %98 = vector.broadcast %cst_24 : f32 to vector<8x96xf32>
    %99 = arith.addf %98, %97 : vector<8x96xf32>
    %100 = arith.divf %98, %99 : vector<8x96xf32>
    %101 = vector.extract_strided_slice %94 {offsets = [0, 96], sizes = [8, 32], strides = [1, 1]} : vector<8x128xf32> to vector<8x32xf32>
    %102 = math.tanh %101 : vector<8x32xf32>
    %103 = vector.extract_strided_slice %100 {offsets = [0, 0], sizes = [8, 32], strides = [1, 1]} : vector<8x96xf32> to vector<8x32xf32>
    %104 = vector.extract_strided_slice %100 {offsets = [0, 32], sizes = [8, 32], strides = [1, 1]} : vector<8x96xf32> to vector<8x32xf32>
    %105 = vector.extract_strided_slice %100 {offsets = [0, 64], sizes = [8, 32], strides = [1, 1]} : vector<8x96xf32> to vector<8x32xf32>
    %106 = arith.mulf %104, %87 : vector<8x32xf32>
    %107 = arith.mulf %103, %102 : vector<8x32xf32>
    %108 = arith.addf %106, %107 : vector<8x32xf32>
    %109 = math.tanh %108 : vector<8x32xf32>
    %110 = arith.mulf %105, %109 : vector<8x32xf32>
    %c0_25 = arith.constant 0 : index
    %c5 = arith.constant 5 : index
    %c0_26 = arith.constant 0 : index
    %111 = vector.load %arg1[%c0_25, %c5, %c0_26] : memref<8x8x32xf32, #tpu.memory_space<vmem>>, vector<8x1x32xf32>
    %112 = vector.shape_cast %111 : vector<8x1x32xf32> to vector<8x32xf32>
    %113 = tpu.concatenate %112, %110 in 1 : vector<8x32xf32>, vector<8x32xf32> -> vector<8x64xf32>
    %cst_27 = arith.constant dense<0.000000e+00> : vector<8x128xf32>
    %114 = tpu.matmul %113, %0, %cst_27 {dimension_numbers = #tpu.dot_dimension_numbers<[1], [0], [0], [1], [0, 0, 1, 1], [], []>} : vector<8x64xf32>, vector<64x128xf32>, vector<8x128xf32> -> vector<8x128xf32>
    %115 = arith.addf %114, %3 : vector<8x128xf32>
    %116 = vector.extract_strided_slice %115 {offsets = [0, 0], sizes = [8, 96], strides = [1, 1]} : vector<8x128xf32> to vector<8x96xf32>
    %117 = arith.negf %116 : vector<8x96xf32>
    %118 = math.exp %117 : vector<8x96xf32>
    %cst_28 = arith.constant 1.000000e+00 : f32
    %119 = vector.broadcast %cst_28 : f32 to vector<8x96xf32>
    %120 = arith.addf %119, %118 : vector<8x96xf32>
    %121 = arith.divf %119, %120 : vector<8x96xf32>
    %122 = vector.extract_strided_slice %115 {offsets = [0, 96], sizes = [8, 32], strides = [1, 1]} : vector<8x128xf32> to vector<8x32xf32>
    %123 = math.tanh %122 : vector<8x32xf32>
    %124 = vector.extract_strided_slice %121 {offsets = [0, 0], sizes = [8, 32], strides = [1, 1]} : vector<8x96xf32> to vector<8x32xf32>
    %125 = vector.extract_strided_slice %121 {offsets = [0, 32], sizes = [8, 32], strides = [1, 1]} : vector<8x96xf32> to vector<8x32xf32>
    %126 = vector.extract_strided_slice %121 {offsets = [0, 64], sizes = [8, 32], strides = [1, 1]} : vector<8x96xf32> to vector<8x32xf32>
    %127 = arith.mulf %125, %108 : vector<8x32xf32>
    %128 = arith.mulf %124, %123 : vector<8x32xf32>
    %129 = arith.addf %127, %128 : vector<8x32xf32>
    %130 = math.tanh %129 : vector<8x32xf32>
    %131 = arith.mulf %126, %130 : vector<8x32xf32>
    %c0_29 = arith.constant 0 : index
    %c6 = arith.constant 6 : index
    %c0_30 = arith.constant 0 : index
    %132 = vector.load %arg1[%c0_29, %c6, %c0_30] : memref<8x8x32xf32, #tpu.memory_space<vmem>>, vector<8x1x32xf32>
    %133 = vector.shape_cast %132 : vector<8x1x32xf32> to vector<8x32xf32>
    %134 = tpu.concatenate %133, %131 in 1 : vector<8x32xf32>, vector<8x32xf32> -> vector<8x64xf32>
    %cst_31 = arith.constant dense<0.000000e+00> : vector<8x128xf32>
    %135 = tpu.matmul %134, %0, %cst_31 {dimension_numbers = #tpu.dot_dimension_numbers<[1], [0], [0], [1], [0, 0, 1, 1], [], []>} : vector<8x64xf32>, vector<64x128xf32>, vector<8x128xf32> -> vector<8x128xf32>
    %136 = arith.addf %135, %3 : vector<8x128xf32>
    %137 = vector.extract_strided_slice %136 {offsets = [0, 0], sizes = [8, 96], strides = [1, 1]} : vector<8x128xf32> to vector<8x96xf32>
    %138 = arith.negf %137 : vector<8x96xf32>
    %139 = math.exp %138 : vector<8x96xf32>
    %cst_32 = arith.constant 1.000000e+00 : f32
    %140 = vector.broadcast %cst_32 : f32 to vector<8x96xf32>
    %141 = arith.addf %140, %139 : vector<8x96xf32>
    %142 = arith.divf %140, %141 : vector<8x96xf32>
    %143 = vector.extract_strided_slice %136 {offsets = [0, 96], sizes = [8, 32], strides = [1, 1]} : vector<8x128xf32> to vector<8x32xf32>
    %144 = math.tanh %143 : vector<8x32xf32>
    %145 = vector.extract_strided_slice %142 {offsets = [0, 0], sizes = [8, 32], strides = [1, 1]} : vector<8x96xf32> to vector<8x32xf32>
    %146 = vector.extract_strided_slice %142 {offsets = [0, 32], sizes = [8, 32], strides = [1, 1]} : vector<8x96xf32> to vector<8x32xf32>
    %147 = vector.extract_strided_slice %142 {offsets = [0, 64], sizes = [8, 32], strides = [1, 1]} : vector<8x96xf32> to vector<8x32xf32>
    %148 = arith.mulf %146, %129 : vector<8x32xf32>
    %149 = arith.mulf %145, %144 : vector<8x32xf32>
    %150 = arith.addf %148, %149 : vector<8x32xf32>
    %151 = math.tanh %150 : vector<8x32xf32>
    %152 = arith.mulf %147, %151 : vector<8x32xf32>
    %c0_33 = arith.constant 0 : index
    %c7 = arith.constant 7 : index
    %c0_34 = arith.constant 0 : index
    %153 = vector.load %arg1[%c0_33, %c7, %c0_34] : memref<8x8x32xf32, #tpu.memory_space<vmem>>, vector<8x1x32xf32>
    %154 = vector.shape_cast %153 : vector<8x1x32xf32> to vector<8x32xf32>
    %155 = tpu.concatenate %154, %152 in 1 : vector<8x32xf32>, vector<8x32xf32> -> vector<8x64xf32>
    %cst_35 = arith.constant dense<0.000000e+00> : vector<8x128xf32>
    %156 = tpu.matmul %155, %0, %cst_35 {dimension_numbers = #tpu.dot_dimension_numbers<[1], [0], [0], [1], [0, 0, 1, 1], [], []>} : vector<8x64xf32>, vector<64x128xf32>, vector<8x128xf32> -> vector<8x128xf32>
    %157 = arith.addf %156, %3 : vector<8x128xf32>
    %158 = vector.extract_strided_slice %157 {offsets = [0, 0], sizes = [8, 96], strides = [1, 1]} : vector<8x128xf32> to vector<8x96xf32>
    %159 = arith.negf %158 : vector<8x96xf32>
    %160 = math.exp %159 : vector<8x96xf32>
    %cst_36 = arith.constant 1.000000e+00 : f32
    %161 = vector.broadcast %cst_36 : f32 to vector<8x96xf32>
    %162 = arith.addf %161, %160 : vector<8x96xf32>
    %163 = arith.divf %161, %162 : vector<8x96xf32>
    %164 = vector.extract_strided_slice %157 {offsets = [0, 96], sizes = [8, 32], strides = [1, 1]} : vector<8x128xf32> to vector<8x32xf32>
    %165 = math.tanh %164 : vector<8x32xf32>
    %166 = vector.extract_strided_slice %163 {offsets = [0, 0], sizes = [8, 32], strides = [1, 1]} : vector<8x96xf32> to vector<8x32xf32>
    %167 = vector.extract_strided_slice %163 {offsets = [0, 32], sizes = [8, 32], strides = [1, 1]} : vector<8x96xf32> to vector<8x32xf32>
    %168 = vector.extract_strided_slice %163 {offsets = [0, 64], sizes = [8, 32], strides = [1, 1]} : vector<8x96xf32> to vector<8x32xf32>
    %169 = arith.mulf %167, %150 : vector<8x32xf32>
    %170 = arith.mulf %166, %165 : vector<8x32xf32>
    %171 = arith.addf %169, %170 : vector<8x32xf32>
    %172 = math.tanh %171 : vector<8x32xf32>
    %173 = arith.mulf %168, %172 : vector<8x32xf32>
    %c0_37 = arith.constant 0 : index
    %c0_38 = arith.constant 0 : index
    %c0_39 = arith.constant 0 : index
    %174 = vector.load %arg4[%c0_37, %c0_38, %c0_39] : memref<8x5x32xf32, #tpu.memory_space<vmem>>, vector<8x1x32xf32>
    %175 = vector.shape_cast %174 : vector<8x1x32xf32> to vector<8x32xf32>
    %176 = vector.shape_cast %173 : vector<8x32xf32> to vector<8x1x32xf32>
    tpu.vector_store %arg4[%c0_37, %c0_38, %c0_39], %176 {strides = array<i32>} : memref<8x5x32xf32, #tpu.memory_space<vmem>>, vector<8x1x32xf32>,
    %177 = tpu.concatenate %173, %173 in 1 : vector<8x32xf32>, vector<8x32xf32> -> vector<8x64xf32>
    %cst_40 = arith.constant dense<0.000000e+00> : vector<8x128xf32>
    %178 = tpu.matmul %177, %0, %cst_40 {dimension_numbers = #tpu.dot_dimension_numbers<[1], [0], [0], [1], [0, 0, 1, 1], [], []>} : vector<8x64xf32>, vector<64x128xf32>, vector<8x128xf32> -> vector<8x128xf32>
    %179 = arith.addf %178, %3 : vector<8x128xf32>
    %180 = vector.extract_strided_slice %179 {offsets = [0, 0], sizes = [8, 96], strides = [1, 1]} : vector<8x128xf32> to vector<8x96xf32>
    %181 = arith.negf %180 : vector<8x96xf32>
    %182 = math.exp %181 : vector<8x96xf32>
    %cst_41 = arith.constant 1.000000e+00 : f32
    %183 = vector.broadcast %cst_41 : f32 to vector<8x96xf32>
    %184 = arith.addf %183, %182 : vector<8x96xf32>
    %185 = arith.divf %183, %184 : vector<8x96xf32>
    %186 = vector.extract_strided_slice %179 {offsets = [0, 96], sizes = [8, 32], strides = [1, 1]} : vector<8x128xf32> to vector<8x32xf32>
    %187 = math.tanh %186 : vector<8x32xf32>
    %188 = vector.extract_strided_slice %185 {offsets = [0, 0], sizes = [8, 32], strides = [1, 1]} : vector<8x96xf32> to vector<8x32xf32>
    %189 = vector.extract_strided_slice %185 {offsets = [0, 32], sizes = [8, 32], strides = [1, 1]} : vector<8x96xf32> to vector<8x32xf32>
    %190 = vector.extract_strided_slice %185 {offsets = [0, 64], sizes = [8, 32], strides = [1, 1]} : vector<8x96xf32> to vector<8x32xf32>
    %191 = arith.mulf %189, %171 : vector<8x32xf32>
    %192 = arith.mulf %188, %187 : vector<8x32xf32>
    %193 = arith.addf %191, %192 : vector<8x32xf32>
    %194 = math.tanh %193 : vector<8x32xf32>
    %195 = arith.mulf %190, %194 : vector<8x32xf32>
    %c0_42 = arith.constant 0 : index
    %c1_43 = arith.constant 1 : index
    %c0_44 = arith.constant 0 : index
    %196 = vector.load %arg4[%c0_42, %c1_43, %c0_44] : memref<8x5x32xf32, #tpu.memory_space<vmem>>, vector<8x1x32xf32>
    %197 = vector.shape_cast %196 : vector<8x1x32xf32> to vector<8x32xf32>
    %198 = vector.shape_cast %195 : vector<8x32xf32> to vector<8x1x32xf32>
    tpu.vector_store %arg4[%c0_42, %c1_43, %c0_44], %198 {strides = array<i32>} : memref<8x5x32xf32, #tpu.memory_space<vmem>>, vector<8x1x32xf32>,
    %199 = tpu.concatenate %195, %195 in 1 : vector<8x32xf32>, vector<8x32xf32> -> vector<8x64xf32>
    %cst_45 = arith.constant dense<0.000000e+00> : vector<8x128xf32>
    %200 = tpu.matmul %199, %0, %cst_45 {dimension_numbers = #tpu.dot_dimension_numbers<[1], [0], [0], [1], [0, 0, 1, 1], [], []>} : vector<8x64xf32>, vector<64x128xf32>, vector<8x128xf32> -> vector<8x128xf32>
    %201 = arith.addf %200, %3 : vector<8x128xf32>
    %202 = vector.extract_strided_slice %201 {offsets = [0, 0], sizes = [8, 96], strides = [1, 1]} : vector<8x128xf32> to vector<8x96xf32>
    %203 = arith.negf %202 : vector<8x96xf32>
    %204 = math.exp %203 : vector<8x96xf32>
    %cst_46 = arith.constant 1.000000e+00 : f32
    %205 = vector.broadcast %cst_46 : f32 to vector<8x96xf32>
    %206 = arith.addf %205, %204 : vector<8x96xf32>
    %207 = arith.divf %205, %206 : vector<8x96xf32>
    %208 = vector.extract_strided_slice %201 {offsets = [0, 96], sizes = [8, 32], strides = [1, 1]} : vector<8x128xf32> to vector<8x32xf32>
    %209 = math.tanh %208 : vector<8x32xf32>
    %210 = vector.extract_strided_slice %207 {offsets = [0, 0], sizes = [8, 32], strides = [1, 1]} : vector<8x96xf32> to vector<8x32xf32>
    %211 = vector.extract_strided_slice %207 {offsets = [0, 32], sizes = [8, 32], strides = [1, 1]} : vector<8x96xf32> to vector<8x32xf32>
    %212 = vector.extract_strided_slice %207 {offsets = [0, 64], sizes = [8, 32], strides = [1, 1]} : vector<8x96xf32> to vector<8x32xf32>
    %213 = arith.mulf %211, %193 : vector<8x32xf32>
    %214 = arith.mulf %210, %209 : vector<8x32xf32>
    %215 = arith.addf %213, %214 : vector<8x32xf32>
    %216 = math.tanh %215 : vector<8x32xf32>
    %217 = arith.mulf %212, %216 : vector<8x32xf32>
    %c0_47 = arith.constant 0 : index
    %c2_48 = arith.constant 2 : index
    %c0_49 = arith.constant 0 : index
    %218 = vector.load %arg4[%c0_47, %c2_48, %c0_49] : memref<8x5x32xf32, #tpu.memory_space<vmem>>, vector<8x1x32xf32>
    %219 = vector.shape_cast %218 : vector<8x1x32xf32> to vector<8x32xf32>
    %220 = vector.shape_cast %217 : vector<8x32xf32> to vector<8x1x32xf32>
    tpu.vector_store %arg4[%c0_47, %c2_48, %c0_49], %220 {strides = array<i32>} : memref<8x5x32xf32, #tpu.memory_space<vmem>>, vector<8x1x32xf32>,
    %221 = tpu.concatenate %217, %217 in 1 : vector<8x32xf32>, vector<8x32xf32> -> vector<8x64xf32>
    %cst_50 = arith.constant dense<0.000000e+00> : vector<8x128xf32>
    %222 = tpu.matmul %221, %0, %cst_50 {dimension_numbers = #tpu.dot_dimension_numbers<[1], [0], [0], [1], [0, 0, 1, 1], [], []>} : vector<8x64xf32>, vector<64x128xf32>, vector<8x128xf32> -> vector<8x128xf32>
    %223 = arith.addf %222, %3 : vector<8x128xf32>
    %224 = vector.extract_strided_slice %223 {offsets = [0, 0], sizes = [8, 96], strides = [1, 1]} : vector<8x128xf32> to vector<8x96xf32>
    %225 = arith.negf %224 : vector<8x96xf32>
    %226 = math.exp %225 : vector<8x96xf32>
    %cst_51 = arith.constant 1.000000e+00 : f32
    %227 = vector.broadcast %cst_51 : f32 to vector<8x96xf32>
    %228 = arith.addf %227, %226 : vector<8x96xf32>
    %229 = arith.divf %227, %228 : vector<8x96xf32>
    %230 = vector.extract_strided_slice %223 {offsets = [0, 96], sizes = [8, 32], strides = [1, 1]} : vector<8x128xf32> to vector<8x32xf32>
    %231 = math.tanh %230 : vector<8x32xf32>
    %232 = vector.extract_strided_slice %229 {offsets = [0, 0], sizes = [8, 32], strides = [1, 1]} : vector<8x96xf32> to vector<8x32xf32>
    %233 = vector.extract_strided_slice %229 {offsets = [0, 32], sizes = [8, 32], strides = [1, 1]} : vector<8x96xf32> to vector<8x32xf32>
    %234 = vector.extract_strided_slice %229 {offsets = [0, 64], sizes = [8, 32], strides = [1, 1]} : vector<8x96xf32> to vector<8x32xf32>
    %235 = arith.mulf %233, %215 : vector<8x32xf32>
    %236 = arith.mulf %232, %231 : vector<8x32xf32>
    %237 = arith.addf %235, %236 : vector<8x32xf32>
    %238 = math.tanh %237 : vector<8x32xf32>
    %239 = arith.mulf %234, %238 : vector<8x32xf32>
    %c0_52 = arith.constant 0 : index
    %c3_53 = arith.constant 3 : index
    %c0_54 = arith.constant 0 : index
    %240 = vector.load %arg4[%c0_52, %c3_53, %c0_54] : memref<8x5x32xf32, #tpu.memory_space<vmem>>, vector<8x1x32xf32>
    %241 = vector.shape_cast %240 : vector<8x1x32xf32> to vector<8x32xf32>
    %242 = vector.shape_cast %239 : vector<8x32xf32> to vector<8x1x32xf32>
    tpu.vector_store %arg4[%c0_52, %c3_53, %c0_54], %242 {strides = array<i32>} : memref<8x5x32xf32, #tpu.memory_space<vmem>>, vector<8x1x32xf32>,
    %243 = tpu.concatenate %239, %239 in 1 : vector<8x32xf32>, vector<8x32xf32> -> vector<8x64xf32>
    %cst_55 = arith.constant dense<0.000000e+00> : vector<8x128xf32>
    %244 = tpu.matmul %243, %0, %cst_55 {dimension_numbers = #tpu.dot_dimension_numbers<[1], [0], [0], [1], [0, 0, 1, 1], [], []>} : vector<8x64xf32>, vector<64x128xf32>, vector<8x128xf32> -> vector<8x128xf32>
    %245 = arith.addf %244, %3 : vector<8x128xf32>
    %246 = vector.extract_strided_slice %245 {offsets = [0, 0], sizes = [8, 96], strides = [1, 1]} : vector<8x128xf32> to vector<8x96xf32>
    %247 = arith.negf %246 : vector<8x96xf32>
    %248 = math.exp %247 : vector<8x96xf32>
    %cst_56 = arith.constant 1.000000e+00 : f32
    %249 = vector.broadcast %cst_56 : f32 to vector<8x96xf32>
    %250 = arith.addf %249, %248 : vector<8x96xf32>
    %251 = arith.divf %249, %250 : vector<8x96xf32>
    %252 = vector.extract_strided_slice %245 {offsets = [0, 96], sizes = [8, 32], strides = [1, 1]} : vector<8x128xf32> to vector<8x32xf32>
    %253 = math.tanh %252 : vector<8x32xf32>
    %254 = vector.extract_strided_slice %251 {offsets = [0, 0], sizes = [8, 32], strides = [1, 1]} : vector<8x96xf32> to vector<8x32xf32>
    %255 = vector.extract_strided_slice %251 {offsets = [0, 32], sizes = [8, 32], strides = [1, 1]} : vector<8x96xf32> to vector<8x32xf32>
    %256 = vector.extract_strided_slice %251 {offsets = [0, 64], sizes = [8, 32], strides = [1, 1]} : vector<8x96xf32> to vector<8x32xf32>
    %257 = arith.mulf %255, %237 : vector<8x32xf32>
    %258 = arith.mulf %254, %253 : vector<8x32xf32>
    %259 = arith.addf %257, %258 : vector<8x32xf32>
    %260 = math.tanh %259 : vector<8x32xf32>
    %261 = arith.mulf %256, %260 : vector<8x32xf32>
    %c0_57 = arith.constant 0 : index
    %c4_58 = arith.constant 4 : index
    %c0_59 = arith.constant 0 : index
    %262 = vector.load %arg4[%c0_57, %c4_58, %c0_59] : memref<8x5x32xf32, #tpu.memory_space<vmem>>, vector<8x1x32xf32>
    %263 = vector.shape_cast %262 : vector<8x1x32xf32> to vector<8x32xf32>
    %264 = vector.shape_cast %261 : vector<8x32xf32> to vector<8x1x32xf32>
    tpu.vector_store %arg4[%c0_57, %c4_58, %c0_59], %264 {strides = array<i32>} : memref<8x5x32xf32, #tpu.memory_space<vmem>>, vector<8x1x32xf32>,
    return
  }
  func.func @transform_0(%arg0: i32) -> (i32, i32, i32) {
    %c0_i32 = arith.constant 0 : i32
    %c0_i32_0 = arith.constant 0 : i32
    %c0_i32_1 = arith.constant 0 : i32
    %c0_i32_2 = arith.constant 0 : i32
    return %c0_i32, %c0_i32_0, %c0_i32_1 : i32, i32, i32
  }
  func.func @transform_1(%arg0: i32) -> (i32, i32) {
    %c0_i32 = arith.constant 0 : i32
    %c0_i32_0 = arith.constant 0 : i32
    %c0_i32_1 = arith.constant 0 : i32
    return %c0_i32, %c0_i32_0 : i32, i32
  }
  func.func @transform_2(%arg0: i32) -> (i32, i32) {
    %c0_i32 = arith.constant 0 : i32
    %c0_i32_0 = arith.constant 0 : i32
    %c0_i32_1 = arith.constant 0 : i32
    return %c0_i32, %c0_i32_0 : i32, i32
  }
  func.func @transform_3(%arg0: i32) -> (i32, i32, i32) {
    %c0_i32 = arith.constant 0 : i32
    %c0_i32_0 = arith.constant 0 : i32
    %c0_i32_1 = arith.constant 0 : i32
    %c0_i32_2 = arith.constant 0 : i32
    return %c0_i32, %c0_i32_0, %c0_i32_1 : i32, i32, i32
  }
}

</mosaic_0001>

<bundles_post_ra>
// kernel: predictor_block_pallas.1
= control target key start
LH: loop header
LB: loop body
LE: loop exit
PB: predicated region body
PF: predicated region fallthrough
CT: control target
= control target key end

     0   :  { %vm43_vm0 = vcmask 1041409   ;;  %vm46_vm1 = vcmask 1042434   ;;  %vm49_vm2 = vcmask 1043459   ;;  %vm52_vm3 = vcmask 1044484   ;;  %s1437_s18 = smov 32   ;;  %s1438_s19 = smov 96   ;;  %s2210_s1 = inlined_call_operand.vmem [shape: f32[64,128], index: 1, kind: input, shape index: {}]   ;;  %s2211_s0 = inlined_call_operand.vmem [shape: f32[8,8,32], index: 0, kind: input, shape index: {}]   ;;  %s2212_s2 = inlined_call_operand.vmem [shape: f32[1,128], index: 2, kind: input, shape index: {}]   ;;  %s2213_s3 = inlined_call_operand.vmem [shape: f32[8,5,32], index: 3, kind: output, shape index: {}]  }
   0x1   :  { %v1463_v0 = vld [vmem:[%s2210_s1 + $0x38] sm:$0xff]  ;;  %v1468_v1 = vld [vmem:[%s2210_s1 + $0x30] sm:$0xff]  ;;  %v1475_v2 = vld [vmem:[%s2210_s1 + $0x28] sm:$0xff]  ;;  %vm55_vm4 = vcmask 1045509   ;;  %vm58_vm5 = vcmask 1046534   ;;  %vm61_vm6 = vcmask 1047559  }
   0x2   :  { %78 = vmatpush.msra.mxu0 %v1463_v0  ;;  %174 = vmatpush.msra.mxu1 %v1463_v0  ;;  %v1480_v3 = vld [vmem:[%s2210_s1 + $0x20] sm:$0xff]  ;;  %v27_v4 = vld [vmem:[%s2211_s0 + $0x8] sm:$0x1]  ;;  %v28_v5 = vld [vmem:[%s2211_s0 + $0x10] sm:$0x1]  ;;  %vm64_vm7 = vcmask 261120  }
   0x3   :  { %270 = vmatpush.msra.mxu2 %v1463_v0  ;;  %366 = vmatpush.msra.mxu3 %v1463_v0  ;;  %v29_v6 = vld [vmem:[%s2211_s0 + $0x18] sm:$0x1]  ;;  %v26_v7 = vld [vmem:[%s2211_s0] sm:$0x1]  ;;  %v31_v9 = vld [vmem:[%s2211_s0 + $0x28] sm:$0x1] }
   0x4   :  { %79 = vmatpush.msra.mxu0 %v1468_v1  ;;  %175 = vmatpush.msra.mxu1 %v1468_v1  ;;  %v30_v8 = vld [vmem:[%s2211_s0 + $0x20] sm:$0x1]  ;;  %v32_v10 = vld [vmem:[%s2211_s0 + $0x30] sm:$0x1]  ;;  %v42_v11 = vrot.slane %v27_v4, 7  ;;  %v45_v12 = vrot.slane %v28_v5, 6 }
   0x5   :  { %271 = vmatpush.msra.mxu2 %v1468_v1  ;;  %367 = vmatpush.msra.mxu3 %v1468_v1  ;;  %v48_v13 = vrot.slane %v29_v6, 5  ;;  %v1514_v14 = vld [vmem:[%s2210_s1 + $0x18] sm:$0xff]  ;;  %v51_v16 = vrot.slane %v30_v8, 4  ;;  %v54_v18 = vrot.slane %v31_v9, 3  ;;  %v1527_v19 = vld [vmem:[%s2210_s1 + $0x10] sm:$0xff]  ;;  %v57_v21 = vrot.slane %v32_v10, 2 }
   0x6   :  { %80 = vmatpush.msra.mxu0 %v1475_v2  ;;  %176 = vmatpush.msra.mxu1 %v1475_v2  ;;  %v33_v15 = vld [vmem:[%s2211_s0 + $0x38] sm:$0x1]  ;;  %v44_v17 = vsel %vm43_vm0, %v42_v11, %v26_v7  ;;  %v1538_v24 = vld [vmem:[%s2210_s1 + $0x8] sm:$0xff]  ;;  %v1549_v27 = vld [vmem:[%s2210_s1] sm:$0xff]  ;;  %vm66_vm8 = vcmask 523264  }
   0x7   :  { %272 = vmatpush.msra.mxu2 %v1475_v2  ;;  %368 = vmatpush.msra.mxu3 %v1475_v2  ;;  %v47_v20 = vsel %vm46_vm1, %v45_v12, %v44_v17  ;;  %v60_v23 = vrot.slane %v33_v15, 1  ;;  %v1608_v31 = vld [vmem:[%s2212_s2] ss:$0 sm:$0xff]  ;;  %v128_v56 = vld [vmem:[%s2211_s0 + $0x9] sm:$0x1] }
   0x8   :  { %81 = vmatpush.msra.mxu0 %v1480_v3  ;;  %177 = vmatpush.msra.mxu1 %v1480_v3  ;;  %v50_v22 = vsel %vm49_vm2, %v48_v13, %v47_v20  ;;  %v129_v57 = vld [vmem:[%s2211_s0 + $0x11] sm:$0x1]  ;;  %v143_v58 = vrot.slane %v128_v56, 7  ;;  %v127_v59 = vld [vmem:[%s2211_s0 + $0x1] sm:$0x1] }
   0x9   :  { %273 = vmatpush.msra.mxu2 %v1480_v3  ;;  %369 = vmatpush.msra.mxu3 %v1480_v3  ;;  %v53_v25 = vsel %vm52_vm3, %v51_v16, %v50_v22  ;;  %v130_v60 = vld [vmem:[%s2211_s0 + $0x19] sm:$0x1]  ;;  %v145_v61 = vrot.slane %v129_v57, 6  ;;  %v131_v63 = vld [vmem:[%s2211_s0 + $0x21] sm:$0x1] }
   0xa   :  { %82 = vmatpush.msra.mxu0 %v1514_v14  ;;  %178 = vmatpush.msra.mxu1 %v1514_v14  ;;  %v56_v26 = vsel %vm55_vm4, %v54_v18, %v53_v25  ;;  %v144_v62 = vsel %vm43_vm0, %v143_v58, %v127_v59  ;;  %v147_v4 = vrot.slane %v130_v60, 5  ;;  %v132_v6 = vld [vmem:[%s2211_s0 + $0x29] sm:$0x1]  ;;  %v149_v7 = vrot.slane %v131_v63, 4  ;;  %v133_v9 = vld [vmem:[%s2211_s0 + $0x31] sm:$0x1] }
   0xb   :  { %274 = vmatpush.msra.mxu2 %v1514_v14  ;;  %370 = vmatpush.msra.mxu3 %v1514_v14  ;;  %v59_v28 = vsel %vm58_vm5, %v57_v21, %v56_v26  ;;  %v146_v5 = vsel %vm46_vm1, %v145_v61, %v144_v62  ;;  %v151_v10 = vrot.slane %v132_v6, 3  ;;  %v134_v12 = vld [vmem:[%s2211_s0 + $0x39] sm:$0x1]  ;;  %v153_v13 = vrot.slane %v133_v9, 2  ;;  %v227_v56 = vld [vmem:[%s2211_s0 + $0x22] sm:$0x1] }
   0xc   :  { %83 = vmatpush.msra.mxu0 %v1527_v19  ;;  %179 = vmatpush.msra.mxu1 %v1527_v19  ;;  %v62_v29 = vsel %vm61_vm6, %v60_v23, %v59_v28  ;;  %v148_v8 = vsel %vm49_vm2, %v147_v4, %v146_v5  ;;  %v155_v16 = vrot.slane %v134_v12, 1  ;;  %v228_v59 = vld [vmem:[%s2211_s0 + $0x2a] sm:$0x1]  ;;  %v245_v60 = vrot.slane %v227_v56, 4  ;;  %v229_v62 = vld [vmem:[%s2211_s0 + $0x32] sm:$0x1] }
   0xd   :  { %275 = vmatpush.msra.mxu2 %v1527_v19  ;;  %371 = vmatpush.msra.mxu3 %v1527_v19  ;;  %v65_v30 = vsel %vm64_vm7, %v62_v29, 0.0  ;;  %v150_v11 = vsel %vm52_vm3, %v149_v7, %v148_v8  ;;  %v247_v63 = vrot.slane %v228_v59, 3  ;;  %v230_v5 = vld [vmem:[%s2211_s0 + $0x3a] sm:$0x1]  ;;  %v249_v6 = vrot.slane %v229_v62, 2 }
   0xe   :  { %84 = vmatpush.msra.mxu0 %v1538_v24  ;;  %180 = vmatpush.msra.mxu1 %v1538_v24  ;;  %v152_v15 = vsel %vm55_vm4, %v151_v10, %v150_v11  ;;  %v251_v8 = vrot.slane %v230_v5, 1 }
   0xf   :  { %276 = vmatpush.msra.mxu2 %v1538_v24  ;;  %372 = vmatpush.msra.mxu3 %v1538_v24  ;;  %v154_v17 = vsel %vm58_vm5, %v153_v13, %v152_v15 }
  0x10   :  { %85 = vmatpush.msra.mxu0 %v1549_v27  ;;  %181 = vmatpush.msra.mxu1 %v1549_v27  ;;  %v156_v18 = vsel %vm61_vm6, %v155_v16, %v154_v17 }
  0x11   :  { %1312 = vmatmul.msk.f32.vlgmr.msra.gmra.mxu0 %vm66_vm8, %v65_v30  ;;  %277 = vmatpush.msra.mxu2 %v1549_v27 }
  0x12   :  { %373 = vmatpush.msra.mxu3 %v1549_v27  ;;  %462 = vmatpush.msrb.mxu0 %v1463_v0 }
  0x13   :  { %558 = vmatpush.msrb.mxu1 %v1463_v0  ;;  %654 = vmatpush.msrb.mxu2 %v1463_v0 }
  0x14   :  { %463 = vmatpush.msrb.mxu0 %v1468_v1  ;;  %750 = vmatpush.msrb.mxu3 %v1463_v0 }
  0x15   :  { %559 = vmatpush.msrb.mxu1 %v1468_v1  ;;  %655 = vmatpush.msrb.mxu2 %v1468_v1 }
  0x16   :  { %464 = vmatpush.msrb.mxu0 %v1475_v2  ;;  %751 = vmatpush.msrb.mxu3 %v1468_v1 }
  0x17   :  { %560 = vmatpush.msrb.mxu1 %v1475_v2  ;;  %656 = vmatpush.msrb.mxu2 %v1475_v2 }
  0x18   :  { %465 = vmatpush.msrb.mxu0 %v1480_v3  ;;  %752 = vmatpush.msrb.mxu3 %v1475_v2 }
  0x19   :  { %561 = vmatpush.msrb.mxu1 %v1480_v3  ;;  %657 = vmatpush.msrb.mxu2 %v1480_v3 }
  0x1a   :  { %466 = vmatpush.msrb.mxu0 %v1514_v14  ;;  %753 = vmatpush.msrb.mxu3 %v1480_v3 }
  0x1b   :  { %562 = vmatpush.msrb.mxu1 %v1514_v14  ;;  %658 = vmatpush.msrb.mxu2 %v1514_v14 }
  0x1c   :  { %467 = vmatpush.msrb.mxu0 %v1527_v19  ;;  %754 = vmatpush.msrb.mxu3 %v1514_v14 }
  0x1d   :  { %563 = vmatpush.msrb.mxu1 %v1527_v19  ;;  %659 = vmatpush.msrb.mxu2 %v1527_v19 }
  0x1e   :  { %468 = vmatpush.msrb.mxu0 %v1538_v24  ;;  %755 = vmatpush.msrb.mxu3 %v1527_v19 }
  0x1f   :  { %564 = vmatpush.msrb.mxu1 %v1538_v24  ;;  %660 = vmatpush.msrb.mxu2 %v1538_v24 }
  0x20   :  { %469 = vmatpush.msrb.mxu0 %v1549_v27  ;;  %756 = vmatpush.msrb.mxu3 %v1538_v24 }
  0x21   :  { %565 = vmatpush.msrb.mxu1 %v1549_v27  ;;  %661 = vmatpush.msrb.mxu2 %v1549_v27 }
  0x22   :  { %757 = vmatpush.msrb.mxu3 %v1549_v27  ;;  %866 = vmatpush.msra.mxu0 %v1463_v0 }
  0x24   :  { %867 = vmatpush.msra.mxu0 %v1468_v1 }
  0x26   :  { %868 = vmatpush.msra.mxu0 %v1475_v2 }
  0x28   :  { %869 = vmatpush.msra.mxu0 %v1480_v3 }
  0x2a   :  { %870 = vmatpush.msra.mxu0 %v1514_v14 }
  0x2c   :  { %871 = vmatpush.msra.mxu0 %v1527_v19 }
  0x2e   :  { %872 = vmatpush.msra.mxu0 %v1538_v24 }
  0x30   :  { %873 = vmatpush.msra.mxu0 %v1549_v27 }
  0x8e   :  { %v87_v32 = vpop.f32.mrf.mxu0 }
  0x8f   :  { %v88_v33 = vadd.f32 %v1608_v31, %v87_v32 }
  0x91   :  { %1340 = vtanh.f32 %v88_v33  ;;  %v1313_v35 = vmul.f32 -1.442695, %v88_v33 }
  0x93   :  { %1342 = vpow2.f32 %v1313_v35 }
  0x97   :  { %v1341_v34 = vpop.eup %1340 }
  0x98   :  { %112 = vrot.lane.b32.xlu0 %v1341_v34, %s1437_s18 }
  0x99   :  { %v1343_v36 = vpop.eup %1342 }
  0x9a   :  { %v93_v37 = vadd.f32 1.0, %v1343_v36 }
  0x9c   :  { %1344 = vrcp.f32 %v93_v37  ;;  %v105_v43 = vand.u32 2147483648, %v93_v37  ;;  %vm99_vm10 = vweird.f32 %v93_v37  ;;  %v103_v44 = vand.u32 2147483647, %v93_v37 }
  0x9e   :  { %v106_v46 = vor.u32 1.1754944e-38, %v105_v43  ;;  %vm104_vm12 = vcmp.eq.f32.partialorder %v103_v44, 8.507059e+37 }
  0xa2   :  { %v1345_v38 = vpop.eup %1344 }
  0xa3   :  { %v95_v39 = vmul.f32 %v1345_v38, %v93_v37  ;;  %vm100_vm9 = vweird.f32 %v1345_v38 }
  0xa4   :  { %vm101_vm11 = vmor %vm99_vm10, %vm100_vm9 }
  0xa5   :  { %v96_v40 = vsub.f32 1.0, %v95_v39 }
  0xa7   :  { %v97_v41 = vmul.f32 %v1345_v38, %v96_v40 }
  0xa9   :  { %v98_v42 = vadd.f32 %v1345_v38, %v97_v41 }
  0xab   :  { %v102_v45 = vsel %vm101_vm11, %v1345_v38, %v98_v42 }
  0xac   :  { %v107_v48 = vsel %vm104_vm12, %v106_v46, %v102_v45 }
  0xad   :  { %v110_v50 = vmul.f32 0.0, %v107_v48 }
 0x10a   :  { %v113_v47 = vpop.permute.xlu0 %112 }
 0x10b   :  { %v115_v49 = vmul.f32 %v113_v47, %v107_v48 }
 0x10d   :  { %117 = vrot.lane.b32.xlu0 %v115_v49, %s1437_s18  ;;  %v224_v49 = vld [vmem:[%s2211_s0 + $0xa] sm:$0x1] }
 0x17f   :  { %v118_v51 = vpop.permute.xlu0 %117 }
 0x180   :  { %v1613_v52 = vadd.f32 %v118_v51, %v110_v50  ;;  %v225_v50 = vld [vmem:[%s2211_s0 + $0x12] sm:$0x1]  ;;  %v239_v51 = vrot.slane %v224_v49, 7  ;;  %v323_v49 = vld [vmem:[%s2211_s0 + $0x23] sm:$0x1] }
 0x182   :  { %1346 = vtanh.f32 %v1613_v52 }
 0x188   :  { %v1347_v53 = vpop.eup %1346 }
 0x189   :  { %123 = vrot.lane.b32.xlu1 %v1347_v53, %s1437_s18  ;;  %v226_v53 = vld [vmem:[%s2211_s0 + $0x1a] sm:$0x1] }
 0x18a   :  { %v243_v57 = vrot.slane %v226_v53, 5  ;;  %v341_v53 = vrot.slane %v323_v49, 4 }
 0x1fb   :  { %v124_v54 = vpop.permute.xlu1 %123 }
 0x1fc   :  { %v126_v55 = vmul.f32 %v124_v54, %v107_v48  ;;  %v241_v54 = vrot.slane %v225_v50, 6 }
 0x1fe   :  { %159 = vrot.lane.b32.xlu1 %v126_v55, %s1438_s19 }
 0x270   :  { %v160_v20 = vpop.permute.xlu1 %159 }
 0x271   :  { %v162_v21 = vsel %vm64_vm7, %v156_v18, %v160_v20 }
 0x272   :  { %1314 = vmatmul.msk.f32.vlgmr.msra.gmra.mxu1 %vm66_vm8, %v162_v21 }
 0x273   :  { %981 = vmatpush.msra.mxu1 %v1463_v0 }
 0x275   :  { %982 = vmatpush.msra.mxu1 %v1468_v1 }
 0x277   :  { %983 = vmatpush.msra.mxu1 %v1475_v2 }
 0x279   :  { %984 = vmatpush.msra.mxu1 %v1480_v3 }
 0x27b   :  { %985 = vmatpush.msra.mxu1 %v1514_v14 }
 0x27d   :  { %986 = vmatpush.msra.mxu1 %v1527_v19 }
 0x27f   :  { %987 = vmatpush.msra.mxu1 %v1538_v24 }
 0x281   :  { %988 = vmatpush.msra.mxu1 %v1549_v27 }
 0x2ef   :  { %v183_v22 = vpop.f32.mrf.mxu1 }
 0x2f0   :  { %v184_v23 = vadd.f32 %v1608_v31, %v183_v22 }
 0x2f2   :  { %1348 = vtanh.f32 %v184_v23  ;;  %v1315_v26 = vmul.f32 -1.442695, %v184_v23 }
 0x2f4   :  { %1350 = vpow2.f32 %v1315_v26 }
 0x2f8   :  { %v1349_v25 = vpop.eup %1348 }
 0x2f9   :  { %208 = vrot.lane.b32.xlu2 %v1349_v25, %s1437_s18 }
 0x2fa   :  { %v1351_v28 = vpop.eup %1350 }
 0x2fb   :  { %v189_v29 = vadd.f32 1.0, %v1351_v28 }
 0x2fd   :  { %1352 = vrcp.f32 %v189_v29  ;;  %v201_v36 = vand.u32 2147483648, %v189_v29  ;;  %vm195_vm14 = vweird.f32 %v189_v29  ;;  %v199_v37 = vand.u32 2147483647, %v189_v29 }
 0x2ff   :  { %v202_v39 = vor.u32 1.1754944e-38, %v201_v36  ;;  %vm200_vm9 = vcmp.eq.f32.partialorder %v199_v37, 8.507059e+37 }
 0x303   :  { %v1353_v30 = vpop.eup %1352 }
 0x304   :  { %v191_v32 = vmul.f32 %v1353_v30, %v189_v29  ;;  %vm196_vm13 = vweird.f32 %v1353_v30 }
 0x305   :  { %vm197_vm15 = vmor %vm195_vm14, %vm196_vm13 }
 0x306   :  { %v192_v33 = vsub.f32 1.0, %v191_v32 }
 0x308   :  { %v193_v34 = vmul.f32 %v1353_v30, %v192_v33 }
 0x30a   :  { %v194_v35 = vadd.f32 %v1353_v30, %v193_v34 }
 0x30c   :  { %v198_v38 = vsel %vm197_vm15, %v1353_v30, %v194_v35 }
 0x30d   :  { %v203_v41 = vsel %vm200_vm9, %v202_v39, %v198_v38 }
 0x30e   :  { %v206_v43 = vmul.f32 %v203_v41, %v1613_v52  ;;  %v223_v52 = vld [vmem:[%s2211_s0 + $0x2] sm:$0x1] }
 0x30f   :  { %v240_v55 = vsel %vm43_vm0, %v239_v51, %v223_v52  ;;  %v324_v52 = vld [vmem:[%s2211_s0 + $0x2b] sm:$0x1] }
 0x310   :  { %v242_v58 = vsel %vm46_vm1, %v241_v54, %v240_v55  ;;  %v325_v55 = vld [vmem:[%s2211_s0 + $0x33] sm:$0x1]  ;;  %v343_v56 = vrot.slane %v324_v52, 3 }
 0x311   :  { %v244_v61 = vsel %vm49_vm2, %v243_v57, %v242_v58  ;;  %v326_v58 = vld [vmem:[%s2211_s0 + $0x3b] sm:$0x1]  ;;  %v345_v59 = vrot.slane %v325_v55, 2 }
 0x312   :  { %v246_v4 = vsel %vm52_vm3, %v245_v60, %v244_v61  ;;  %v347_v61 = vrot.slane %v326_v58, 1 }
 0x313   :  { %v248_v7 = vsel %vm55_vm4, %v247_v63, %v246_v4 }
 0x314   :  { %v250_v9 = vsel %vm58_vm5, %v249_v6, %v248_v7 }
 0x315   :  { %v252_v10 = vsel %vm61_vm6, %v251_v8, %v250_v9 }
 0x353   :  { %v209_v40 = vpop.permute.xlu2 %208 }
 0x354   :  { %v211_v42 = vmul.f32 %v209_v40, %v203_v41 }
 0x356   :  { %213 = vrot.lane.b32.xlu2 %v211_v42, %s1437_s18  ;;  %v320_v42 = vld [vmem:[%s2211_s0 + $0xb] sm:$0x1] }
 0x3b0   :  { %v214_v44 = vpop.permute.xlu2 %213 }
 0x3b1   :  { %v1663_v45 = vadd.f32 %v214_v44, %v206_v43  ;;  %v321_v43 = vld [vmem:[%s2211_s0 + $0x13] sm:$0x1]  ;;  %v335_v44 = vrot.slane %v320_v42, 7 }
 0x3b3   :  { %1354 = vtanh.f32 %v1663_v45 }
 0x3b9   :  { %v1355_v46 = vpop.eup %1354 }
 0x3ba   :  { %219 = vrot.lane.b32.xlu0 %v1355_v46, %s1437_s18  ;;  %v322_v46 = vld [vmem:[%s2211_s0 + $0x1b] sm:$0x1] }
 0x3bb   :  { %v339_v50 = vrot.slane %v322_v46, 5 }
 0x42c   :  { %v220_v47 = vpop.permute.xlu0 %219 }
 0x42d   :  { %v222_v48 = vmul.f32 %v220_v47, %v203_v41  ;;  %v337_v47 = vrot.slane %v321_v43, 6  ;;  %v422_v43 = vld [vmem:[%s2211_s0 + $0x3c] sm:$0x1] }
 0x42e   :  { %v443_v46 = vrot.slane %v422_v43, 1 }
 0x42f   :  { %255 = vrot.lane.b32.xlu1 %v222_v48, %s1438_s19 }
 0x4a1   :  { %v256_v11 = vpop.permute.xlu1 %255 }
 0x4a2   :  { %v258_v12 = vsel %vm64_vm7, %v252_v10, %v256_v11 }
 0x4a3   :  { %1316 = vmatmul.msk.f32.vlgmr.msra.gmra.mxu2 %vm66_vm8, %v258_v12 }
 0x4a4   :  { %1096 = vmatpush.msra.mxu2 %v1463_v0 }
 0x4a6   :  { %1097 = vmatpush.msra.mxu2 %v1468_v1 }
 0x4a8   :  { %1098 = vmatpush.msra.mxu2 %v1475_v2 }
 0x4aa   :  { %1099 = vmatpush.msra.mxu2 %v1480_v3 }
 0x4ac   :  { %1100 = vmatpush.msra.mxu2 %v1514_v14 }
 0x4ae   :  { %1101 = vmatpush.msra.mxu2 %v1527_v19 }
 0x4b0   :  { %1102 = vmatpush.msra.mxu2 %v1538_v24 }
 0x4b2   :  { %1103 = vmatpush.msra.mxu2 %v1549_v27 }
 0x526   :  { %v279_v13 = vpop.f32.mrf.mxu2 }
 0x527   :  { %v280_v15 = vadd.f32 %v1608_v31, %v279_v13 }
 0x529   :  { %1356 = vtanh.f32 %v280_v15  ;;  %v1317_v17 = vmul.f32 -1.442695, %v280_v15 }
 0x52b   :  { %1358 = vpow2.f32 %v1317_v17 }
 0x52f   :  { %v1357_v16 = vpop.eup %1356 }
 0x530   :  { %304 = vrot.lane.b32.xlu2 %v1357_v16, %s1437_s18 }
 0x531   :  { %v1359_v18 = vpop.eup %1358 }
 0x532   :  { %v285_v20 = vadd.f32 1.0, %v1359_v18 }
 0x534   :  { %1360 = vrcp.f32 %v285_v20  ;;  %v297_v28 = vand.u32 2147483648, %v285_v20  ;;  %vm291_vm11 = vweird.f32 %v285_v20  ;;  %v295_v29 = vand.u32 2147483647, %v285_v20 }
 0x536   :  { %v298_v32 = vor.u32 1.1754944e-38, %v297_v28  ;;  %vm296_vm13 = vcmp.eq.f32.partialorder %v295_v29, 8.507059e+37  ;;  %v415_v29 = vld [vmem:[%s2211_s0 + $0x4] sm:$0x1] }
 0x53a   :  { %v1361_v21 = vpop.eup %1360 }
 0x53b   :  { %v287_v22 = vmul.f32 %v1361_v21, %v285_v20  ;;  %vm292_vm10 = vweird.f32 %v1361_v21 }
 0x53c   :  { %vm293_vm12 = vmor %vm291_vm11, %vm292_vm10 }
 0x53d   :  { %v288_v23 = vsub.f32 1.0, %v287_v22 }
 0x53f   :  { %v289_v25 = vmul.f32 %v1361_v21, %v288_v23 }
 0x541   :  { %v290_v26 = vadd.f32 %v1361_v21, %v289_v25  ;;  %v416_v25 = vld [vmem:[%s2211_s0 + $0xc] sm:$0x1] }
 0x542   :  { %v431_v28 = vrot.slane %v416_v25, 7 }
 0x543   :  { %v294_v30 = vsel %vm293_vm12, %v1361_v21, %v290_v26  ;;  %v417_v26 = vld [vmem:[%s2211_s0 + $0x14] sm:$0x1] }
 0x544   :  { %v299_v34 = vsel %vm296_vm13, %v298_v32, %v294_v30  ;;  %v418_v30 = vld [vmem:[%s2211_s0 + $0x1c] sm:$0x1]  ;;  %v433_v32 = vrot.slane %v417_v26, 6  ;;  %v518_v26 = vld [vmem:[%s2211_s0 + $0x3d] sm:$0x1] }
 0x545   :  { %v302_v36 = vmul.f32 %v299_v34, %v1663_v45  ;;  %v319_v45 = vld [vmem:[%s2211_s0 + $0x3] sm:$0x1] }
 0x546   :  { %v336_v48 = vsel %vm43_vm0, %v335_v44, %v319_v45 }
 0x547   :  { %v338_v51 = vsel %vm46_vm1, %v337_v47, %v336_v48 }
 0x548   :  { %v340_v54 = vsel %vm49_vm2, %v339_v50, %v338_v51 }
 0x549   :  { %v342_v57 = vsel %vm52_vm3, %v341_v53, %v340_v54 }
 0x54a   :  { %v344_v60 = vsel %vm55_vm4, %v343_v56, %v342_v57 }
 0x54b   :  { %v346_v62 = vsel %vm58_vm5, %v345_v59, %v344_v60 }
 0x54c   :  { %v348_v63 = vsel %vm61_vm6, %v347_v61, %v346_v62 }
 0x58a   :  { %v305_v33 = vpop.permute.xlu2 %304 }
 0x58b   :  { %v307_v35 = vmul.f32 %v305_v33, %v299_v34  ;;  %v432_v33 = vsel %vm43_vm0, %v431_v28, %v415_v29 }
 0x58d   :  { %309 = vrot.lane.b32.xlu0 %v307_v35, %s1437_s18  ;;  %v435_v35 = vrot.slane %v418_v30, 5  ;;  %v539_v30 = vrot.slane %v518_v26, 1 }
 0x5ff   :  { %v310_v37 = vpop.permute.xlu0 %309 }
 0x600   :  { %v1713_v38 = vadd.f32 %v310_v37, %v302_v36  ;;  %v434_v36 = vsel %vm46_vm1, %v433_v32, %v432_v33  ;;  %v420_v37 = vld [vmem:[%s2211_s0 + $0x2c] sm:$0x1] }
 0x602   :  { %1362 = vtanh.f32 %v1713_v38 }
 0x608   :  { %v1363_v39 = vpop.eup %1362 }
 0x609   :  { %315 = vrot.lane.b32.xlu1 %v1363_v39, %s1437_s18  ;;  %v436_v39 = vsel %vm49_vm2, %v435_v35, %v434_v36 }
 0x67b   :  { %v316_v40 = vpop.permute.xlu1 %315 }
 0x67c   :  { %v318_v41 = vmul.f32 %v316_v40, %v299_v34  ;;  %v419_v34 = vld [vmem:[%s2211_s0 + $0x24] sm:$0x1]  ;;  %v421_v40 = vld [vmem:[%s2211_s0 + $0x34] sm:$0x1] }
 0x67d   :  { %v441_v44 = vrot.slane %v421_v40, 2 }
 0x67e   :  { %351 = vrot.lane.b32.xlu2 %v318_v41, %s1438_s19  ;;  %v439_v41 = vrot.slane %v420_v37, 3 }
 0x6d8   :  { %v352_v4 = vpop.permute.xlu2 %351 }
 0x6d9   :  { %v354_v5 = vsel %vm64_vm7, %v348_v63, %v352_v4 }
 0x6da   :  { %1318 = vmatmul.msk.f32.vlgmr.msra.gmra.mxu3 %vm66_vm8, %v354_v5 }
 0x6db   :  { %1211 = vmatpush.msra.mxu3 %v1463_v0 }
 0x6dd   :  { %1212 = vmatpush.msra.mxu3 %v1468_v1 }
 0x6df   :  { %1213 = vmatpush.msra.mxu3 %v1475_v2 }
 0x6e1   :  { %1214 = vmatpush.msra.mxu3 %v1480_v3 }
 0x6e3   :  { %1215 = vmatpush.msra.mxu3 %v1514_v14 }
 0x6e5   :  { %1216 = vmatpush.msra.mxu3 %v1527_v19 }
 0x6e7   :  { %1217 = vmatpush.msra.mxu3 %v1538_v24 }
 0x6e9   :  { %1218 = vmatpush.msra.mxu3 %v1549_v27 }
 0x75d   :  { %v375_v6 = vpop.f32.mrf.mxu3 }
 0x75e   :  { %v376_v7 = vadd.f32 %v1608_v31, %v375_v6 }
 0x760   :  { %1364 = vtanh.f32 %v376_v7  ;;  %v1319_v0 = vmul.f32 -1.442695, %v376_v7 }
 0x762   :  { %1366 = vpow2.f32 %v1319_v0 }
 0x766   :  { %v1365_v8 = vpop.eup %1364 }
 0x767   :  { %400 = vrot.lane.b32.xlu0 %v1365_v8, %s1437_s18 }
 0x768   :  { %v1367_v1 = vpop.eup %1366 }
 0x769   :  { %v381_v2 = vadd.f32 1.0, %v1367_v1 }
 0x76b   :  { %1368 = vrcp.f32 %v381_v2  ;;  %v393_v24 = vand.u32 2147483648, %v381_v2  ;;  %vm387_vm15 = vweird.f32 %v381_v2  ;;  %v391_v27 = vand.u32 2147483647, %v381_v2 }
 0x76d   :  { %v394_v12 = vor.u32 1.1754944e-38, %v393_v24  ;;  %vm392_vm10 = vcmp.eq.f32.partialorder %v391_v27, 8.507059e+37  ;;  %v511_v27 = vld [vmem:[%s2211_s0 + $0x5] sm:$0x1] }
 0x771   :  { %v1369_v3 = vpop.eup %1368 }
 0x772   :  { %v383_v14 = vmul.f32 %v1369_v3, %v381_v2  ;;  %vm388_vm14 = vweird.f32 %v1369_v3 }
 0x773   :  { %vm389_vm9 = vmor %vm387_vm15, %vm388_vm14 }
 0x774   :  { %v384_v9 = vsub.f32 1.0, %v383_v14 }
 0x776   :  { %v385_v19 = vmul.f32 %v1369_v3, %v384_v9 }
 0x778   :  { %v386_v10 = vadd.f32 %v1369_v3, %v385_v19  ;;  %v512_v19 = vld [vmem:[%s2211_s0 + $0xd] sm:$0x1] }
 0x779   :  { %v527_v24 = vrot.slane %v512_v19, 7 }
 0x77a   :  { %v390_v11 = vsel %vm389_vm9, %v1369_v3, %v386_v10  ;;  %v513_v10 = vld [vmem:[%s2211_s0 + $0x15] sm:$0x1] }
 0x77b   :  { %v395_v15 = vsel %vm392_vm10, %v394_v12, %v390_v11  ;;  %v514_v11 = vld [vmem:[%s2211_s0 + $0x1d] sm:$0x1]  ;;  %v529_v12 = vrot.slane %v513_v10, 6  ;;  %v614_v10 = vld [vmem:[%s2211_s0 + $0x3e] sm:$0x1] }
 0x77c   :  { %v398_v17 = vmul.f32 %v395_v15, %v1713_v38  ;;  %v437_v38 = vrot.slane %v419_v34, 4 }
 0x77e   :  { %v438_v42 = vsel %vm52_vm3, %v437_v38, %v436_v39 }
 0x77f   :  { %v440_v45 = vsel %vm55_vm4, %v439_v41, %v438_v42 }
 0x780   :  { %v442_v47 = vsel %vm58_vm5, %v441_v44, %v440_v45 }
 0x781   :  { %v444_v48 = vsel %vm61_vm6, %v443_v46, %v442_v47 }
 0x7d9   :  { %v401_v13 = vpop.permute.xlu0 %400 }
 0x7da   :  { %v403_v16 = vmul.f32 %v401_v13, %v395_v15  ;;  %v528_v13 = vsel %vm43_vm0, %v527_v24, %v511_v27 }
 0x7dc   :  { %405 = vrot.lane.b32.xlu1 %v403_v16, %s1437_s18  ;;  %v531_v16 = vrot.slane %v514_v11, 5  ;;  %v635_v11 = vrot.slane %v614_v10, 1 }
 0x84e   :  { %v406_v18 = vpop.permute.xlu1 %405 }
 0x84f   :  { %v408_v20 = vadd.f32 %v406_v18, %v398_v17  ;;  %v530_v17 = vsel %vm46_vm1, %v529_v12, %v528_v13  ;;  %v516_v18 = vld [vmem:[%s2211_s0 + $0x2d] sm:$0x1] }
 0x851   :  { %1370 = vtanh.f32 %v408_v20 }
 0x857   :  { %v1371_v21 = vpop.eup %1370 }
 0x858   :  { %411 = vrot.lane.b32.xlu2 %v1371_v21, %s1437_s18  ;;  %v532_v21 = vsel %vm49_vm2, %v531_v16, %v530_v17 }
 0x8b2   :  { %v412_v22 = vpop.permute.xlu2 %411 }
 0x8b3   :  { %v414_v23 = vmul.f32 %v412_v22, %v395_v15  ;;  %v515_v15 = vld [vmem:[%s2211_s0 + $0x25] sm:$0x1]  ;;  %v517_v22 = vld [vmem:[%s2211_s0 + $0x35] sm:$0x1] }
 0x8b4   :  { %v537_v28 = vrot.slane %v517_v22, 2 }
 0x8b5   :  { %447 = vrot.lane.b32.xlu0 %v414_v23, %s1438_s19  ;;  %v535_v23 = vrot.slane %v516_v18, 3 }
 0x927   :  { %v448_v49 = vpop.permute.xlu0 %447 }
 0x928   :  { %v450_v50 = vsel %vm64_vm7, %v444_v48, %v448_v49 }
 0x929   :  { %1320 = vmatmul.msk.f32.vlgmr.msrb.gmra.mxu0 %vm66_vm8, %v450_v50 }
 0x9a6   :  { %v471_v51 = vpop.f32.mrf.mxu0 }
 0x9a7   :  { %v472_v52 = vadd.f32 %v1608_v31, %v471_v51 }
 0x9a9   :  { %1372 = vtanh.f32 %v472_v52  ;;  %v1321_v54 = vmul.f32 -1.442695, %v472_v52 }
 0x9ab   :  { %1374 = vpow2.f32 %v1321_v54 }
 0x9af   :  { %v1373_v53 = vpop.eup %1372 }
 0x9b0   :  { %496 = vrot.lane.b32.xlu1 %v1373_v53, %s1437_s18 }
 0x9b1   :  { %v1375_v55 = vpop.eup %1374 }
 0x9b2   :  { %v477_v56 = vadd.f32 1.0, %v1375_v55 }
 0x9b4   :  { %1376 = vrcp.f32 %v477_v56  ;;  %v489_v62 = vand.u32 2147483648, %v477_v56  ;;  %vm483_vm12 = vweird.f32 %v477_v56  ;;  %v487_v63 = vand.u32 2147483647, %v477_v56 }
 0x9b6   :  { %v490_v5 = vor.u32 1.1754944e-38, %v489_v62  ;;  %vm488_vm14 = vcmp.eq.f32.partialorder %v487_v63, 8.507059e+37  ;;  %v607_v63 = vld [vmem:[%s2211_s0 + $0x6] sm:$0x1] }
 0x9ba   :  { %v1377_v57 = vpop.eup %1376 }
 0x9bb   :  { %v479_v58 = vmul.f32 %v1377_v57, %v477_v56  ;;  %vm484_vm11 = vweird.f32 %v1377_v57 }
 0x9bc   :  { %vm485_vm13 = vmor %vm483_vm12, %vm484_vm11 }
 0x9bd   :  { %v480_v59 = vsub.f32 1.0, %v479_v58 }
 0x9bf   :  { %v481_v60 = vmul.f32 %v1377_v57, %v480_v59 }
 0x9c1   :  { %v482_v61 = vadd.f32 %v1377_v57, %v481_v60  ;;  %v608_v60 = vld [vmem:[%s2211_s0 + $0xe] sm:$0x1] }
 0x9c2   :  { %v623_v62 = vrot.slane %v608_v60, 7 }
 0x9c3   :  { %v486_v4 = vsel %vm485_vm13, %v1377_v57, %v482_v61  ;;  %v609_v61 = vld [vmem:[%s2211_s0 + $0x16] sm:$0x1] }
 0x9c4   :  { %v491_v7 = vsel %vm488_vm14, %v490_v5, %v486_v4  ;;  %v610_v4 = vld [vmem:[%s2211_s0 + $0x1e] sm:$0x1]  ;;  %v625_v5 = vrot.slane %v609_v61, 6  ;;  %v710_v61 = vld [vmem:[%s2211_s0 + $0x3f] sm:$0x1] }
 0x9c5   :  { %v494_v0 = vmul.f32 %v491_v7, %v408_v20  ;;  %v533_v20 = vrot.slane %v515_v15, 4 }
 0x9c7   :  { %v534_v25 = vsel %vm52_vm3, %v533_v20, %v532_v21 }
 0x9c8   :  { %v536_v29 = vsel %vm55_vm4, %v535_v23, %v534_v25 }
 0x9c9   :  { %v538_v32 = vsel %vm58_vm5, %v537_v28, %v536_v29 }
 0x9ca   :  { %v540_v33 = vsel %vm61_vm6, %v539_v30, %v538_v32 }
 0xa22   :  { %v497_v6 = vpop.permute.xlu1 %496 }
 0xa23   :  { %v499_v8 = vmul.f32 %v497_v6, %v491_v7  ;;  %v624_v6 = vsel %vm43_vm0, %v623_v62, %v607_v63 }
 0xa25   :  { %501 = vrot.lane.b32.xlu2 %v499_v8, %s1437_s18  ;;  %v627_v8 = vrot.slane %v610_v4, 5  ;;  %v731_v4 = vrot.slane %v710_v61, 1 }
 0xa7f   :  { %v502_v1 = vpop.permute.xlu2 %501 }
 0xa80   :  { %v504_v2 = vadd.f32 %v502_v1, %v494_v0  ;;  %v626_v0 = vsel %vm46_vm1, %v625_v5, %v624_v6  ;;  %v612_v1 = vld [vmem:[%s2211_s0 + $0x2e] sm:$0x1] }
 0xa82   :  { %1378 = vtanh.f32 %v504_v2 }
 0xa88   :  { %v1379_v3 = vpop.eup %1378 }
 0xa89   :  { %507 = vrot.lane.b32.xlu0 %v1379_v3, %s1437_s18  ;;  %v628_v3 = vsel %vm49_vm2, %v627_v8, %v626_v0 }
 0xafb   :  { %v508_v14 = vpop.permute.xlu0 %507 }
 0xafc   :  { %v510_v9 = vmul.f32 %v508_v14, %v491_v7  ;;  %v611_v7 = vld [vmem:[%s2211_s0 + $0x26] sm:$0x1]  ;;  %v613_v14 = vld [vmem:[%s2211_s0 + $0x36] sm:$0x1] }
 0xafd   :  { %v633_v24 = vrot.slane %v613_v14, 2 }
 0xafe   :  { %543 = vrot.lane.b32.xlu1 %v510_v9, %s1438_s19  ;;  %v631_v9 = vrot.slane %v612_v1, 3 }
 0xb70   :  { %v544_v34 = vpop.permute.xlu1 %543 }
 0xb71   :  { %v546_v35 = vsel %vm64_vm7, %v540_v33, %v544_v34 }
 0xb72   :  { %1322 = vmatmul.msk.f32.vlgmr.msrb.gmra.mxu1 %vm66_vm8, %v546_v35 }
 0xbef   :  { %v567_v36 = vpop.f32.mrf.mxu1 }
 0xbf0   :  { %v568_v37 = vadd.f32 %v1608_v31, %v567_v36 }
 0xbf2   :  { %1380 = vtanh.f32 %v568_v37  ;;  %v1323_v39 = vmul.f32 -1.442695, %v568_v37 }
 0xbf4   :  { %1382 = vpow2.f32 %v1323_v39 }
 0xbf8   :  { %v1381_v38 = vpop.eup %1380 }
 0xbf9   :  { %592 = vrot.lane.b32.xlu2 %v1381_v38, %s1437_s18 }
 0xbfa   :  { %v1383_v40 = vpop.eup %1382 }
 0xbfb   :  { %v573_v41 = vadd.f32 1.0, %v1383_v40 }
 0xbfd   :  { %1384 = vrcp.f32 %v573_v41  ;;  %v585_v47 = vand.u32 2147483648, %v573_v41  ;;  %vm579_vm9 = vweird.f32 %v573_v41  ;;  %v583_v48 = vand.u32 2147483647, %v573_v41 }
 0xbff   :  { %v586_v50 = vor.u32 1.1754944e-38, %v585_v47  ;;  %vm584_vm11 = vcmp.eq.f32.partialorder %v583_v48, 8.507059e+37  ;;  %v703_v48 = vld [vmem:[%s2211_s0 + $0x7] sm:$0x1] }
 0xc03   :  { %v1385_v42 = vpop.eup %1384 }
 0xc04   :  { %v575_v43 = vmul.f32 %v1385_v42, %v573_v41  ;;  %vm580_vm15 = vweird.f32 %v1385_v42 }
 0xc05   :  { %vm581_vm10 = vmor %vm579_vm9, %vm580_vm15 }
 0xc06   :  { %v576_v44 = vsub.f32 1.0, %v575_v43 }
 0xc08   :  { %v577_v45 = vmul.f32 %v1385_v42, %v576_v44 }
 0xc0a   :  { %v578_v46 = vadd.f32 %v1385_v42, %v577_v45  ;;  %v704_v45 = vld [vmem:[%s2211_s0 + $0xf] sm:$0x1] }
 0xc0b   :  { %v719_v47 = vrot.slane %v704_v45, 7 }
 0xc0c   :  { %v582_v49 = vsel %vm581_vm10, %v1385_v42, %v578_v46  ;;  %v705_v46 = vld [vmem:[%s2211_s0 + $0x17] sm:$0x1] }
 0xc0d   :  { %v587_v52 = vsel %vm584_vm11, %v586_v50, %v582_v49  ;;  %v706_v49 = vld [vmem:[%s2211_s0 + $0x1f] sm:$0x1]  ;;  %v721_v50 = vrot.slane %v705_v46, 6 }
 0xc0e   :  { %v590_v54 = vmul.f32 %v587_v52, %v504_v2  ;;  %v629_v2 = vrot.slane %v611_v7, 4 }
 0xc10   :  { %v630_v19 = vsel %vm52_vm3, %v629_v2, %v628_v3 }
 0xc11   :  { %v632_v27 = vsel %vm55_vm4, %v631_v9, %v630_v19 }
 0xc12   :  { %v634_v12 = vsel %vm58_vm5, %v633_v24, %v632_v27 }
 0xc13   :  { %v636_v13 = vsel %vm61_vm6, %v635_v11, %v634_v12 }
 0xc53   :  { %v593_v51 = vpop.permute.xlu2 %592 }
 0xc54   :  { %v595_v53 = vmul.f32 %v593_v51, %v587_v52  ;;  %v720_v51 = vsel %vm43_vm0, %v719_v47, %v703_v48 }
 0xc56   :  { %597 = vrot.lane.b32.xlu0 %v595_v53, %s1437_s18  ;;  %v723_v53 = vrot.slane %v706_v49, 5 }
 0xcc8   :  { %v598_v55 = vpop.permute.xlu0 %597 }
 0xcc9   :  { %v600_v56 = vadd.f32 %v598_v55, %v590_v54  ;;  %v722_v54 = vsel %vm46_vm1, %v721_v50, %v720_v51  ;;  %v708_v55 = vld [vmem:[%s2211_s0 + $0x2f] sm:$0x1] }
 0xccb   :  { %1386 = vtanh.f32 %v600_v56 }
 0xcd1   :  { %v1387_v57 = vpop.eup %1386 }
 0xcd2   :  { %603 = vrot.lane.b32.xlu1 %v1387_v57, %s1437_s18  ;;  %v724_v57 = vsel %vm49_vm2, %v723_v53, %v722_v54 }
 0xd44   :  { %v604_v58 = vpop.permute.xlu1 %603 }
 0xd45   :  { %v606_v59 = vmul.f32 %v604_v58, %v587_v52  ;;  %v707_v52 = vld [vmem:[%s2211_s0 + $0x27] sm:$0x1]  ;;  %v709_v58 = vld [vmem:[%s2211_s0 + $0x37] sm:$0x1]  ;;  %s1439_s0 = smov 64  }
 0xd46   :  { %v729_v62 = vrot.slane %v709_v58, 2 }
 0xd47   :  { %639 = vrot.lane.b32.xlu2 %v606_v59, %s1438_s19  ;;  %v727_v59 = vrot.slane %v708_v55, 3 }
 0xda1   :  { %v640_v15 = vpop.permute.xlu2 %639 }
 0xda2   :  { %v642_v16 = vsel %vm64_vm7, %v636_v13, %v640_v15 }
 0xda3   :  { %1324 = vmatmul.msk.f32.vlgmr.msrb.gmra.mxu2 %vm66_vm8, %v642_v16 }
 0xe26   :  { %v663_v17 = vpop.f32.mrf.mxu2 }
 0xe27   :  { %v664_v18 = vadd.f32 %v1608_v31, %v663_v17 }
 0xe29   :  { %1388 = vtanh.f32 %v664_v18  ;;  %v1325_v21 = vmul.f32 -1.442695, %v664_v18 }
 0xe2b   :  { %1390 = vpow2.f32 %v1325_v21 }
 0xe2f   :  { %v1389_v20 = vpop.eup %1388 }
 0xe30   :  { %688 = vrot.lane.b32.xlu0 %v1389_v20, %s1437_s18 }
 0xe31   :  { %v1391_v22 = vpop.eup %1390 }
 0xe32   :  { %v669_v23 = vadd.f32 1.0, %v1391_v22 }
 0xe34   :  { %1392 = vrcp.f32 %v669_v23  ;;  %v681_v32 = vand.u32 2147483648, %v669_v23  ;;  %vm675_vm13 = vweird.f32 %v669_v23  ;;  %v679_v33 = vand.u32 2147483647, %v669_v23 }
 0xe36   :  { %v682_v35 = vor.u32 1.1754944e-38, %v681_v32  ;;  %vm680_vm15 = vcmp.eq.f32.partialorder %v679_v33, 8.507059e+37 }
 0xe3a   :  { %v1393_v25 = vpop.eup %1392 }
 0xe3b   :  { %v671_v26 = vmul.f32 %v1393_v25, %v669_v23  ;;  %vm676_vm12 = vweird.f32 %v1393_v25 }
 0xe3c   :  { %vm677_vm14 = vmor %vm675_vm13, %vm676_vm12 }
 0xe3d   :  { %v672_v28 = vsub.f32 1.0, %v671_v26 }
 0xe3f   :  { %v673_v29 = vmul.f32 %v1393_v25, %v672_v28 }
 0xe41   :  { %v674_v30 = vadd.f32 %v1393_v25, %v673_v29 }
 0xe43   :  { %v678_v34 = vsel %vm677_vm14, %v1393_v25, %v674_v30 }
 0xe44   :  { %v683_v37 = vsel %vm680_vm15, %v682_v35, %v678_v34 }
 0xe45   :  { %v686_v39 = vmul.f32 %v683_v37, %v600_v56  ;;  %v725_v56 = vrot.slane %v707_v52, 4 }
 0xe47   :  { %v726_v60 = vsel %vm52_vm3, %v725_v56, %v724_v57 }
 0xe48   :  { %v728_v63 = vsel %vm55_vm4, %v727_v59, %v726_v60  ;;  %v1939_v60 = vld [vmem:[%s2212_s2] ss:$0 sm:$0xff] }
 0xe49   :  { %v730_v5 = vsel %vm58_vm5, %v729_v62, %v728_v63 }
 0xe4a   :  { %v732_v6 = vsel %vm61_vm6, %v731_v4, %v730_v5 }
 0xea2   :  { %v689_v36 = vpop.permute.xlu0 %688 }
 0xea3   :  { %v691_v38 = vmul.f32 %v689_v36, %v683_v37 }
 0xea5   :  { %693 = vrot.lane.b32.xlu1 %v691_v38, %s1437_s18 }
 0xf17   :  { %v694_v40 = vpop.permute.xlu1 %693 }
 0xf18   :  { %v696_v41 = vadd.f32 %v694_v40, %v686_v39 }
 0xf1a   :  { %1394 = vtanh.f32 %v696_v41 }
 0xf20   :  { %v1395_v42 = vpop.eup %1394 }
 0xf21   :  { %699 = vrot.lane.b32.xlu2 %v1395_v42, %s1437_s18 }
 0xf7b   :  { %v700_v43 = vpop.permute.xlu2 %699 }
 0xf7c   :  { %v702_v44 = vmul.f32 %v700_v43, %v683_v37 }
 0xf7e   :  { %735 = vrot.lane.b32.xlu0 %v702_v44, %s1438_s19 }
 0xff0   :  { %v736_v7 = vpop.permute.xlu0 %735 }
 0xff1   :  { %v738_v8 = vsel %vm64_vm7, %v732_v6, %v736_v7 }
 0xff2   :  { %1326 = vmatmul.msk.f32.vlgmr.msrb.gmra.mxu3 %vm66_vm8, %v738_v8 }
0x1075   :  { %v759_v0 = vpop.f32.mrf.mxu3 }
0x1076   :  { %v760_v1 = vadd.f32 %v1608_v31, %v759_v0 }
0x1078   :  { %1396 = vtanh.f32 %v760_v1  ;;  %v1327_v3 = vmul.f32 -1.442695, %v760_v1 }
0x107a   :  { %1398 = vpow2.f32 %v1327_v3 }
0x107e   :  { %v1397_v2 = vpop.eup %1396 }
0x107f   :  { %784 = vrot.lane.b32.xlu1 %v1397_v2, %s1437_s18 }
0x1080   :  { %v1399_v14 = vpop.eup %1398 }
0x1081   :  { %v765_v9 = vadd.f32 1.0, %v1399_v14 }
0x1083   :  { %1400 = vrcp.f32 %v765_v9  ;;  %v777_v12 = vand.u32 2147483648, %v765_v9  ;;  %vm771_vm1 = vweird.f32 %v765_v9  ;;  %v775_v13 = vand.u32 2147483647, %v765_v9 }
0x1085   :  { %v778_v16 = vor.u32 1.1754944e-38, %v777_v12  ;;  %vm776_vm3 = vcmp.eq.f32.partialorder %v775_v13, 8.507059e+37 }
0x1089   :  { %v1401_v19 = vpop.eup %1400 }
0x108a   :  { %v767_v10 = vmul.f32 %v1401_v19, %v765_v9  ;;  %vm772_vm0 = vweird.f32 %v1401_v19 }
0x108b   :  { %vm773_vm2 = vmor %vm771_vm1, %vm772_vm0 }
0x108c   :  { %v768_v24 = vsub.f32 1.0, %v767_v10 }
0x108e   :  { %v769_v27 = vmul.f32 %v1401_v19, %v768_v24 }
0x1090   :  { %v770_v11 = vadd.f32 %v1401_v19, %v769_v27 }
0x1092   :  { %v774_v15 = vsel %vm773_vm2, %v1401_v19, %v770_v11  ;;  %vm839_vm2 = vcmask 253952  }
0x1093   :  { %v779_v18 = vsel %vm776_vm3, %v778_v16, %v774_v15 }
0x1094   :  { %v782_v21 = vmul.f32 %v779_v18, %v696_v41 }
0x10f1   :  { %v785_v17 = vpop.permute.xlu1 %784 }
0x10f2   :  { %v787_v20 = vmul.f32 %v785_v17, %v779_v18 }
0x10f4   :  { %789 = vrot.lane.b32.xlu2 %v787_v20, %s1437_s18 }
0x114e   :  { %v790_v22 = vpop.permute.xlu2 %789 }
0x114f   :  { %v792_v23 = vadd.f32 %v790_v22, %v782_v21 }
0x1151   :  { %1402 = vtanh.f32 %v792_v23 }
0x1157   :  { %v1403_v25 = vpop.eup %1402 }
0x1158   :  { %795 = vrot.lane.b32.xlu0 %v1403_v25, %s1437_s18 }
0x11ca   :  { %v796_v26 = vpop.permute.xlu0 %795 }
0x11cb   :  { %v1916_v28 = vmul.f32 %v796_v26, %v779_v18 }
0x11cd   :  { %851 = vrot.lane.b32.xlu2 %v1916_v28, %s1438_s19  ;;  %848 = vrot.lane.b32.xlu1 %v1916_v28, %s1439_s0 }
0x1227   :  { %v852_v29 = vpop.permute.xlu2 %851 }
0x123f   :  { %v849_v30 = vpop.permute.xlu1 %848 }
0x1240   :  { %v854_v32 = vsel %vm64_vm7, %v849_v30, %v852_v29 }
0x1241   :  { %1328 = vmatmul.msk.f32.vlgmr.msra.gmra.mxu0 %vm66_vm8, %v854_v32 }
0x12be   :  { %v875_v33 = vpop.f32.mrf.mxu0 }
0x12bf   :  { %v876_v34 = vadd.f32 %v1608_v31, %v875_v33 }
0x12c1   :  { %1404 = vtanh.f32 %v876_v34  ;;  %v1329_v36 = vmul.f32 -1.442695, %v876_v34 }
0x12c3   :  { %1406 = vpow2.f32 %v1329_v36 }
0x12c7   :  { %v1405_v35 = vpop.eup %1404 }
0x12c8   :  { %900 = vrot.lane.b32.xlu0 %v1405_v35, %s1437_s18 }
0x12c9   :  { %v1407_v37 = vpop.eup %1406 }
0x12ca   :  { %v881_v38 = vadd.f32 1.0, %v1407_v37 }
0x12cc   :  { %1408 = vrcp.f32 %v881_v38  ;;  %v893_v44 = vand.u32 2147483648, %v881_v38  ;;  %vm887_vm5 = vweird.f32 %v881_v38  ;;  %v891_v45 = vand.u32 2147483647, %v881_v38 }
0x12ce   :  { %v894_v46 = vor.u32 1.1754944e-38, %v893_v44  ;;  %vm892_vm9 = vcmp.eq.f32.partialorder %v891_v45, 8.507059e+37 }
0x12d2   :  { %v1409_v39 = vpop.eup %1408 }
0x12d3   :  { %v883_v40 = vmul.f32 %v1409_v39, %v881_v38  ;;  %vm888_vm4 = vweird.f32 %v1409_v39 }
0x12d4   :  { %vm889_vm6 = vmor %vm887_vm5, %vm888_vm4 }
0x12d5   :  { %v884_v41 = vsub.f32 1.0, %v883_v40 }
0x12d7   :  { %v885_v42 = vmul.f32 %v1409_v39, %v884_v41 }
0x12d9   :  { %v886_v43 = vadd.f32 %v1409_v39, %v885_v42 }
0x12db   :  { %v890_v31 = vsel %vm889_vm6, %v1409_v39, %v886_v43 }
0x12dc   :  { %v895_v48 = vsel %vm892_vm9, %v894_v46, %v890_v31 }
0x12dd   :  { %v898_v50 = vmul.f32 %v895_v48, %v792_v23 }
0x133a   :  { %v901_v47 = vpop.permute.xlu0 %900 }
0x133b   :  { %v903_v49 = vmul.f32 %v901_v47, %v895_v48 }
0x133d   :  { %905 = vrot.lane.b32.xlu1 %v903_v49, %s1437_s18  ;;  %v807_v49 = vperm.slane %v1916_v28, 0 }
0x13af   :  { %v906_v51 = vpop.permute.xlu1 %905 }
0x13b0   :  { %v908_v52 = vadd.f32 %v906_v51, %v898_v50  ;;  %v802_v51 = vrot.slane %v1916_v28, 3 }
0x13b2   :  { %1410 = vtanh.f32 %v908_v52 }
0x13b8   :  { %v1411_v53 = vpop.eup %1410 }
0x13b9   :  { %911 = vrot.lane.b32.xlu2 %v1411_v53, %s1437_s18  ;;  %v805_v53 = vrot.slane %v1916_v28, 6 }
0x1413   :  { %v912_v54 = vpop.permute.xlu2 %911 }
0x1414   :  { %v1928_v55 = vmul.f32 %v912_v54, %v895_v48  ;;  %v801_v48 = vrot.slane %v1916_v28, 2  ;;  %v813_v54 = vperm.slane %v805_v53, 0 }
0x1416   :  { %966 = vrot.lane.b32.xlu1 %v1928_v55, %s1438_s19  ;;  %963 = vrot.lane.b32.xlu0 %v1928_v55, %s1439_s0  ;;  %v809_v50 = vperm.slane %v801_v48, 0 }
0x1488   :  { %v967_v56 = vpop.permute.xlu1 %966  ;;  %v964_v57 = vpop.permute.xlu0 %963 }
0x1489   :  { %v969_v58 = vsel %vm64_vm7, %v964_v57, %v967_v56  ;;  %v916_v56 = vrot.slane %v1928_v55, 1 }
0x148a   :  { %1330 = vmatmul.msk.f32.vlgmr.msra.gmra.mxu1 %vm66_vm8, %v969_v58  ;;  %v919_v58 = vrot.slane %v1928_v55, 4 }
0x148b   :  { %v924_v57 = vperm.slane %v916_v56, 0 }
0x1507   :  { %v990_v59 = vpop.f32.mrf.mxu1 }
0x1508   :  { %v991_v61 = vadd.f32 %v1939_v60, %v990_v59  ;;  %v927_v59 = vperm.slane %v919_v58, 0 }
0x150a   :  { %1412 = vtanh.f32 %v991_v61  ;;  %v1331_v63 = vmul.f32 -1.442695, %v991_v61  ;;  %v921_v61 = vrot.slane %v1928_v55, 6 }
0x150c   :  { %1414 = vpow2.f32 %v1331_v63 }
0x1510   :  { %v1413_v62 = vpop.eup %1412 }
0x1511   :  { %1015 = vrot.lane.b32.xlu2 %v1413_v62, %s1437_s18  ;;  %v929_v62 = vperm.slane %v921_v61, 0  ;;  %v804_v61 = vrot.slane %v1916_v28, 5 }
0x1512   :  { %v1415_v4 = vpop.eup %1414 }
0x1513   :  { %v996_v5 = vadd.f32 1.0, %v1415_v4 }
0x1515   :  { %1416 = vrcp.f32 %v996_v5  ;;  %v1008_v2 = vand.u32 2147483648, %v996_v5  ;;  %vm1002_vm11 = vweird.f32 %v996_v5  ;;  %v1006_v3 = vand.u32 2147483647, %v996_v5 }
0x1517   :  { %v1009_v9 = vor.u32 1.1754944e-38, %v1008_v2  ;;  %vm1007_vm13 = vcmp.eq.f32.partialorder %v1006_v3, 8.507059e+37 }
0x151b   :  { %v1417_v6 = vpop.eup %1416 }
0x151c   :  { %v998_v7 = vmul.f32 %v1417_v6, %v996_v5  ;;  %vm1003_vm10 = vweird.f32 %v1417_v6 }
0x151d   :  { %vm1004_vm12 = vmor %vm1002_vm11, %vm1003_vm10 }
0x151e   :  { %v999_v8 = vsub.f32 1.0, %v998_v7 }
0x1520   :  { %v1000_v0 = vmul.f32 %v1417_v6, %v999_v8 }
0x1522   :  { %v1001_v1 = vadd.f32 %v1417_v6, %v1000_v0 }
0x1524   :  { %v1005_v14 = vsel %vm1004_vm12, %v1417_v6, %v1001_v1 }
0x1525   :  { %v1010_v10 = vsel %vm1007_vm13, %v1009_v9, %v1005_v14 }
0x1526   :  { %v1013_v27 = vmul.f32 %v1010_v10, %v908_v52  ;;  %v810_v52 = vperm.slane %v802_v51, 0 }
0x156b   :  { %v1016_v19 = vpop.permute.xlu2 %1015 }
0x156c   :  { %v1018_v24 = vmul.f32 %v1016_v19, %v1010_v10 }
0x156e   :  { %1020 = vrot.lane.b32.xlu0 %v1018_v24, %s1437_s18 }
0x15e0   :  { %v1021_v11 = vpop.permute.xlu0 %1020 }
0x15e1   :  { %v1023_v12 = vadd.f32 %v1021_v11, %v1013_v27 }
0x15e3   :  { %1418 = vtanh.f32 %v1023_v12 }
0x15e9   :  { %v1419_v13 = vpop.eup %1418 }
0x15ea   :  { %1026 = vrot.lane.b32.xlu1 %v1419_v13, %s1437_s18 }
0x165c   :  { %v1027_v15 = vpop.permute.xlu1 %1026 }
0x165d   :  { %v1945_v16 = vmul.f32 %v1027_v15, %v1010_v10 }
0x165f   :  { %1081 = vrot.lane.b32.xlu0 %v1945_v16, %s1438_s19  ;;  %1078 = vrot.lane.b32.xlu2 %v1945_v16, %s1439_s0  ;;  %v1031_v63 = vrot.slane %v1945_v16, 1  ;;  %v1034_v5 = vrot.slane %v1945_v16, 4  ;;  %v1037_v7 = vrot.slane %v1945_v16, 7 }
0x1661   :  { %v1039_v4 = vperm.slane %v1031_v63, 0  ;;  %v1042_v6 = vperm.slane %v1034_v5, 0  ;;  %v1045_v8 = vperm.slane %v1037_v7, 0  ;;  %v812_v63 = vperm.slane %v804_v61, 0 }
0x1662   :  { %v923_v5 = vperm.slane %v1928_v55, 0 }
0x16b9   :  { %v1079_v17 = vpop.permute.xlu2 %1078 }
0x16d1   :  { %v1082_v18 = vpop.permute.xlu0 %1081 }
0x16d2   :  { %v1084_v20 = vsel %vm64_vm7, %v1079_v17, %v1082_v18 }
0x16d3   :  { %1332 = vmatmul.msk.f32.vlgmr.msra.gmra.mxu2 %vm66_vm8, %v1084_v20 }
0x1756   :  { %v1105_v21 = vpop.f32.mrf.mxu2 }
0x1757   :  { %v1106_v22 = vadd.f32 %v1939_v60, %v1105_v21 }
0x1759   :  { %1420 = vtanh.f32 %v1106_v22  ;;  %v1333_v25 = vmul.f32 -1.442695, %v1106_v22 }
0x175b   :  { %1422 = vpow2.f32 %v1333_v25 }
0x175f   :  { %v1421_v23 = vpop.eup %1420 }
0x1760   :  { %1130 = vrot.lane.b32.xlu1 %v1421_v23, %s1437_s18 }
0x1761   :  { %v1423_v26 = vpop.eup %1422 }
0x1762   :  { %v1111_v29 = vadd.f32 1.0, %v1423_v26 }
0x1764   :  { %1424 = vrcp.f32 %v1111_v29  ;;  %v1123_v36 = vand.u32 2147483648, %v1111_v29  ;;  %vm1117_vm15 = vweird.f32 %v1111_v29  ;;  %v1121_v37 = vand.u32 2147483647, %v1111_v29 }
0x1766   :  { %v1124_v39 = vor.u32 1.1754944e-38, %v1123_v36  ;;  %vm1122_vm1 = vcmp.eq.f32.partialorder %v1121_v37, 8.507059e+37  ;;  %v922_v37 = vrot.slane %v1928_v55, 7 }
0x176a   :  { %v1425_v30 = vpop.eup %1424 }
0x176b   :  { %v1113_v32 = vmul.f32 %v1425_v30, %v1111_v29  ;;  %vm1118_vm14 = vweird.f32 %v1425_v30  ;;  %v800_v29 = vrot.slane %v1916_v28, 1 }
0x176c   :  { %vm1119_vm0 = vmor %vm1117_vm15, %vm1118_vm14 }
0x176d   :  { %v1114_v33 = vsub.f32 1.0, %v1113_v32  ;;  %v803_v32 = vrot.slane %v1916_v28, 4 }
0x176f   :  { %v1115_v34 = vmul.f32 %v1425_v30, %v1114_v33  ;;  %v811_v33 = vperm.slane %v803_v32, 0 }
0x1771   :  { %v1116_v35 = vadd.f32 %v1425_v30, %v1115_v34  ;;  %v806_v34 = vrot.slane %v1916_v28, 7  ;;  %v918_v28 = vrot.slane %v1928_v55, 3 }
0x1773   :  { %v1120_v38 = vsel %vm1119_vm0, %v1425_v30, %v1116_v35  ;;  %v808_v30 = vperm.slane %v800_v29, 0  ;;  %v814_v35 = vperm.slane %v806_v34, 0  ;;  %v926_v7 = vperm.slane %v918_v28, 0 }
0x1774   :  { %v1125_v41 = vsel %vm1122_vm1, %v1124_v39, %v1120_v38  ;;  %v930_v38 = vperm.slane %v922_v37, 0  ;;  %v1032_v39 = vrot.slane %v1945_v16, 2 }
0x1775   :  { %v1128_v43 = vmul.f32 %v1125_v41, %v1023_v12 }
0x17d2   :  { %v1131_v40 = vpop.permute.xlu1 %1130 }
0x17d3   :  { %v1133_v42 = vmul.f32 %v1131_v40, %v1125_v41  ;;  %v1040_v40 = vperm.slane %v1032_v39, 0 }
0x17d5   :  { %1135 = vrot.lane.b32.xlu2 %v1133_v42, %s1437_s18 }
0x182f   :  { %v1136_v44 = vpop.permute.xlu2 %1135 }
0x1830   :  { %v1956_v45 = vadd.f32 %v1136_v44, %v1128_v43 }
0x1832   :  { %1426 = vtanh.f32 %v1956_v45 }
0x1838   :  { %v1427_v31 = vpop.eup %1426 }
0x1839   :  { %1141 = vrot.lane.b32.xlu0 %v1427_v31, %s1437_s18 }
0x18ab   :  { %v1142_v46 = vpop.permute.xlu0 %1141 }
0x18ac   :  { %v1960_v47 = vmul.f32 %v1142_v46, %v1125_v41  ;;  %v1035_v41 = vrot.slane %v1945_v16, 5 }
0x18ae   :  { %1196 = vrot.lane.b32.xlu2 %v1960_v47, %s1438_s19  ;;  %1193 = vrot.lane.b32.xlu1 %v1960_v47, %s1439_s0  ;;  %v1147_v0 = vrot.slane %v1960_v47, 2  ;;  %v1150_v2 = vrot.slane %v1960_v47, 5  ;;  %v1043_v42 = vperm.slane %v1035_v41, 0 }
0x18b0   :  { %v1155_v1 = vperm.slane %v1147_v0, 0  ;;  %v1158_v3 = vperm.slane %v1150_v2, 0 }
0x18b6   :  { %815 = vrot.lane.b32.xlu2 %v807_v49, %s1439_s0  ;;  %819 = vrot.lane.b32.xlu1 %v809_v50, %s1439_s0 }
0x18be   :  { %821 = vrot.lane.b32.xlu2 %v810_v52, %s1439_s0 }
0x18c6   :  { %827 = vrot.lane.b32.xlu2 %v813_v54, %s1439_s0 }
0x18ce   :  { %933 = vrot.lane.b32.xlu2 %v924_v57, %s1439_s0 }
0x18d6   :  { %939 = vrot.lane.b32.xlu2 %v927_v59, %s1439_s0 }
0x18de   :  { %943 = vrot.lane.b32.xlu2 %v929_v62, %s1439_s0 }
0x18e6   :  { %1048 = vrot.lane.b32.xlu2 %v1039_v4, %s1439_s0 }
0x18ee   :  { %1054 = vrot.lane.b32.xlu2 %v1042_v6, %s1439_s0 }
0x18f6   :  { %1060 = vrot.lane.b32.xlu2 %v1045_v8, %s1439_s0  ;;  %v920_v8 = vrot.slane %v1928_v55, 5 }
0x18fe   :  { %1165 = vrot.lane.b32.xlu2 %v1155_v1, %s1439_s0  ;;  %v928_v1 = vperm.slane %v920_v8, 0 }
0x1906   :  { %1171 = vrot.lane.b32.xlu2 %v1158_v3, %s1439_s0  ;;  %v1038_v3 = vperm.slane %v1945_v16, 0 }
0x1908   :  { %v1197_v14 = vpop.permute.xlu2 %1196 }
0x1910   :  { %v816_v9 = vpop.permute.xlu2 %815 }
0x1911   :  { %840 = vst.msk [vmem:[%s2213_s3] sm:$0x1] %vm839_vm2, %v816_v9 }
0x1918   :  { %v822_v19 = vpop.permute.xlu2 %821 }
0x1919   :  { %843 = vst.msk [vmem:[%s2213_s3 + $0x18] sm:$0x1] %vm839_vm2, %v822_v19  ;;  %v1036_v19 = vrot.slane %v1945_v16, 6 }
0x1920   :  { %v1194_v10 = vpop.permute.xlu1 %1193  ;;  %v828_v24 = vpop.permute.xlu2 %827 }
0x1921   :  { %v1199_v27 = vsel %vm64_vm7, %v1194_v10, %v1197_v14  ;;  %846 = vst.msk [vmem:[%s2213_s3 + $0x30] sm:$0x1] %vm839_vm2, %v828_v24  ;;  %v1044_v24 = vperm.slane %v1036_v19, 0 }
0x1922   :  { %1334 = vmatmul.msk.f32.vlgmr.msra.gmra.mxu3 %vm66_vm8, %v1199_v27  ;;  %v1146_v27 = vrot.slane %v1960_v47, 1 }
0x1928   :  { %v934_v11 = vpop.permute.xlu2 %933  ;;  %v820_v12 = vpop.permute.xlu1 %819 }
0x1929   :  { %956 = vst.msk [vmem:[%s2213_s3 + $0x9] sm:$0x1] %vm839_vm2, %v934_v11  ;;  %v1154_v11 = vperm.slane %v1146_v27, 0 }
0x192a   :  { %842 = vst.msk [vmem:[%s2213_s3 + $0x10] sm:$0x1] %vm839_vm2, %v820_v12  ;;  %v1149_v12 = vrot.slane %v1960_v47, 4 }
0x1930   :  { %v940_v13 = vpop.permute.xlu2 %939 }
0x1931   :  { %959 = vst.msk [vmem:[%s2213_s3 + $0x21] sm:$0x1] %vm839_vm2, %v940_v13  ;;  %v1157_v13 = vperm.slane %v1149_v12, 0 }
0x1938   :  { %v944_v15 = vpop.permute.xlu2 %943 }
0x1939   :  { %961 = vst.msk [vmem:[%s2213_s3 + $0x31] sm:$0x1] %vm839_vm2, %v944_v15 }
0x1940   :  { %v1049_v17 = vpop.permute.xlu2 %1048 }
0x1941   :  { %1071 = vst.msk [vmem:[%s2213_s3 + $0xa] sm:$0x1] %vm839_vm2, %v1049_v17 }
0x1948   :  { %v1055_v18 = vpop.permute.xlu2 %1054 }
0x1949   :  { %1074 = vst.msk [vmem:[%s2213_s3 + $0x22] sm:$0x1] %vm839_vm2, %v1055_v18 }
0x1950   :  { %v1061_v20 = vpop.permute.xlu2 %1060 }
0x1951   :  { %1077 = vst.msk [vmem:[%s2213_s3 + $0x3a] sm:$0x1] %vm839_vm2, %v1061_v20 }
0x1958   :  { %v1166_v21 = vpop.permute.xlu2 %1165 }
0x1959   :  { %1187 = vst.msk [vmem:[%s2213_s3 + $0x13] sm:$0x1] %vm839_vm2, %v1166_v21 }
0x1960   :  { %v1172_v22 = vpop.permute.xlu2 %1171 }
0x1961   :  { %1190 = vst.msk [vmem:[%s2213_s3 + $0x2b] sm:$0x1] %vm839_vm2, %v1172_v22 }
0x19a5   :  { %v1220_v23 = vpop.f32.mrf.mxu3 }
0x19a6   :  { %v1221_v25 = vadd.f32 %v1939_v60, %v1220_v23  ;;  %v917_v60 = vrot.slane %v1928_v55, 2  ;;  %v1033_v55 = vrot.slane %v1945_v16, 3  ;;  %v1152_v16 = vrot.slane %v1960_v47, 7 }
0x19a8   :  { %1428 = vtanh.f32 %v1221_v25  ;;  %v925_v36 = vperm.slane %v917_v60, 0  ;;  %v1335_v43 = vmul.f32 -1.442695, %v1221_v25  ;;  %v1041_v9 = vperm.slane %v1033_v55, 0 }
0x19a9   :  { %v1160_v15 = vperm.slane %v1152_v16, 0  ;;  %v1153_v25 = vperm.slane %v1960_v47, 0 }
0x19aa   :  { %1430 = vpow2.f32 %v1335_v43 }
0x19ae   :  { %v1429_v26 = vpop.eup %1428 }
0x19af   :  { %1245 = vrot.lane.b32.xlu0 %v1429_v26, %s1437_s18 }
0x19b0   :  { %v1431_v44 = vpop.eup %1430 }
0x19b1   :  { %v1226_v31 = vadd.f32 1.0, %v1431_v44 }
0x19b3   :  { %1432 = vrcp.f32 %v1226_v31  ;;  %v1238_v52 = vand.u32 2147483648, %v1226_v31  ;;  %vm1232_vm8 = vweird.f32 %v1226_v31  ;;  %v1236_v53 = vand.u32 2147483647, %v1226_v31 }
0x19b5   :  { %v1239_v56 = vor.u32 1.1754944e-38, %v1238_v52  ;;  %vm1237_vm4 = vcmp.eq.f32.partialorder %v1236_v53, 8.507059e+37 }
0x19b7   :  { %817 = vrot.lane.b32.xlu0 %v808_v30, %s1439_s0  ;;  %v1151_v30 = vrot.slane %v1960_v47, 6 }
0x19b9   :  { %v1433_v46 = vpop.eup %1432 }
0x19ba   :  { %v1228_v48 = vmul.f32 %v1433_v46, %v1226_v31  ;;  %vm1233_vm7 = vweird.f32 %v1433_v46 }
0x19bb   :  { %vm1234_vm3 = vmor %vm1232_vm8, %vm1233_vm7 }
0x19bc   :  { %v1229_v49 = vsub.f32 1.0, %v1228_v48 }
0x19be   :  { %v1230_v50 = vmul.f32 %v1433_v46, %v1229_v49 }
0x19bf   :  { %823 = vrot.lane.b32.xlu0 %v811_v33, %s1439_s0  ;;  %v1159_v33 = vperm.slane %v1151_v30, 0 }
0x19c0   :  { %v1231_v51 = vadd.f32 %v1433_v46, %v1230_v50 }
0x19c2   :  { %v1235_v54 = vsel %vm1234_vm3, %v1433_v46, %v1231_v51 }
0x19c3   :  { %v2056_v58 = vsel %vm1237_vm4, %v1239_v56, %v1235_v54 }
0x19c4   :  { %v1243_v17 = vmul.f32 %v2056_v58, %v1956_v45  ;;  %v1148_v45 = vrot.slane %v1960_v47, 3 }
0x19c6   :  { %v1156_v29 = vperm.slane %v1148_v45, 0 }
0x19c7   :  { %829 = vrot.lane.b32.xlu0 %v814_v35, %s1439_s0 }
0x19cf   :  { %935 = vrot.lane.b32.xlu0 %v925_v36, %s1439_s0 }
0x19d7   :  { %945 = vrot.lane.b32.xlu0 %v930_v38, %s1439_s0 }
0x19df   :  { %1050 = vrot.lane.b32.xlu0 %v1040_v40, %s1439_s0 }
0x19e7   :  { %1056 = vrot.lane.b32.xlu0 %v1043_v42, %s1439_s0 }
0x1a21   :  { %v1246_v57 = vpop.permute.xlu0 %1245 }
0x1a22   :  { %v1248_v59 = vmul.f32 %v1246_v57, %v2056_v58 }
0x1a24   :  { %1250 = vrot.lane.b32.xlu1 %v1248_v59, %s1437_s18 }
0x1a29   :  { %v818_v62 = vpop.permute.xlu0 %817 }
0x1a2a   :  { %841 = vst.msk [vmem:[%s2213_s3 + $0x8] sm:$0x1] %vm839_vm2, %v818_v62 }
0x1a2c   :  { %825 = vrot.lane.b32.xlu1 %v812_v63, %s1439_s0 }
0x1a31   :  { %v824_v4 = vpop.permute.xlu0 %823 }
0x1a32   :  { %844 = vst.msk [vmem:[%s2213_s3 + $0x20] sm:$0x1] %vm839_vm2, %v824_v4 }
0x1a34   :  { %931 = vrot.lane.b32.xlu1 %v923_v5, %s1439_s0 }
0x1a39   :  { %v830_v6 = vpop.permute.xlu0 %829 }
0x1a3a   :  { %847 = vst.msk [vmem:[%s2213_s3 + $0x38] sm:$0x1] %vm839_vm2, %v830_v6 }
0x1a3c   :  { %937 = vrot.lane.b32.xlu1 %v926_v7, %s1439_s0 }
0x1a41   :  { %v936_v0 = vpop.permute.xlu0 %935 }
0x1a42   :  { %957 = vst.msk [vmem:[%s2213_s3 + $0x11] sm:$0x1] %vm839_vm2, %v936_v0 }
0x1a44   :  { %941 = vrot.lane.b32.xlu1 %v928_v1, %s1439_s0 }
0x1a49   :  { %v946_v2 = vpop.permute.xlu0 %945 }
0x1a4a   :  { %962 = vst.msk [vmem:[%s2213_s3 + $0x39] sm:$0x1] %vm839_vm2, %v946_v2 }
0x1a4c   :  { %1046 = vrot.lane.b32.xlu1 %v1038_v3, %s1439_s0 }
0x1a51   :  { %v1051_v14 = vpop.permute.xlu0 %1050 }
0x1a52   :  { %1072 = vst.msk [vmem:[%s2213_s3 + $0x12] sm:$0x1] %vm839_vm2, %v1051_v14 }
0x1a54   :  { %1052 = vrot.lane.b32.xlu1 %v1041_v9, %s1439_s0 }
0x1a59   :  { %v1057_v10 = vpop.permute.xlu0 %1056 }
0x1a5a   :  { %1075 = vst.msk [vmem:[%s2213_s3 + $0x2a] sm:$0x1] %vm839_vm2, %v1057_v10 }
0x1a5c   :  { %1058 = vrot.lane.b32.xlu1 %v1044_v24, %s1439_s0 }
0x1a64   :  { %1163 = vrot.lane.b32.xlu1 %v1154_v11, %s1439_s0 }
0x1a6c   :  { %1169 = vrot.lane.b32.xlu1 %v1157_v13, %s1439_s0 }
0x1a74   :  { %1175 = vrot.lane.b32.xlu1 %v1160_v15, %s1439_s0 }
0x1a96   :  { %v1251_v18 = vpop.permute.xlu1 %1250 }
0x1a97   :  { %v1253_v20 = vadd.f32 %v1251_v18, %v1243_v17 }
0x1a99   :  { %1434 = vtanh.f32 %v1253_v20 }
0x1a9e   :  { %v826_v21 = vpop.permute.xlu1 %825 }
0x1a9f   :  { %v1435_v22 = vpop.eup %1434  ;;  %845 = vst.msk [vmem:[%s2213_s3 + $0x28] sm:$0x1] %vm839_vm2, %v826_v21 }
0x1aa0   :  { %1256 = vrot.lane.b32.xlu0 %v1435_v22, %s1437_s18 }
0x1aa6   :  { %v932_v23 = vpop.permute.xlu1 %931 }
0x1aa7   :  { %955 = vst.msk [vmem:[%s2213_s3 + $0x1] sm:$0x1] %vm839_vm2, %v932_v23 }
0x1aa8   :  { %1161 = vrot.lane.b32.xlu0 %v1153_v25, %s1439_s0 }
0x1aae   :  { %v938_v26 = vpop.permute.xlu1 %937 }
0x1aaf   :  { %958 = vst.msk [vmem:[%s2213_s3 + $0x19] sm:$0x1] %vm839_vm2, %v938_v26 }
0x1ab0   :  { %1167 = vrot.lane.b32.xlu0 %v1156_v29, %s1439_s0 }
0x1ab6   :  { %v942_v32 = vpop.permute.xlu1 %941 }
0x1ab7   :  { %960 = vst.msk [vmem:[%s2213_s3 + $0x29] sm:$0x1] %vm839_vm2, %v942_v32 }
0x1ab8   :  { %1173 = vrot.lane.b32.xlu0 %v1159_v33, %s1439_s0 }
0x1abe   :  { %v1047_v34 = vpop.permute.xlu1 %1046 }
0x1abf   :  { %1070 = vst.msk [vmem:[%s2213_s3 + $0x2] sm:$0x1] %vm839_vm2, %v1047_v34 }
0x1ac6   :  { %v1053_v35 = vpop.permute.xlu1 %1052 }
0x1ac7   :  { %1073 = vst.msk [vmem:[%s2213_s3 + $0x1a] sm:$0x1] %vm839_vm2, %v1053_v35 }
0x1ace   :  { %v1059_v47 = vpop.permute.xlu1 %1058 }
0x1acf   :  { %1076 = vst.msk [vmem:[%s2213_s3 + $0x32] sm:$0x1] %vm839_vm2, %v1059_v47 }
0x1ad6   :  { %v1164_v60 = vpop.permute.xlu1 %1163 }
0x1ad7   :  { %1186 = vst.msk [vmem:[%s2213_s3 + $0xb] sm:$0x1] %vm839_vm2, %v1164_v60 }
0x1ade   :  { %v1170_v36 = vpop.permute.xlu1 %1169 }
0x1adf   :  { %1189 = vst.msk [vmem:[%s2213_s3 + $0x23] sm:$0x1] %vm839_vm2, %v1170_v36 }
0x1ae6   :  { %v1176_v37 = vpop.permute.xlu1 %1175 }
0x1ae7   :  { %1192 = vst.msk [vmem:[%s2213_s3 + $0x3b] sm:$0x1] %vm839_vm2, %v1176_v37 }
0x1b12   :  { %v1257_v38 = vpop.permute.xlu0 %1256 }
0x1b13   :  { %v1259_v39 = vmul.f32 %v1257_v38, %v2056_v58 }
0x1b15   :  { %v1268_v40 = vperm.slane %v1259_v39, 0  ;;  %v1262_v41 = vrot.slane %v1259_v39, 2  ;;  %v1261_v42 = vrot.slane %v1259_v39, 1  ;;  %v1263_v31 = vrot.slane %v1259_v39, 3 }
0x1b16   :  { %v1265_v48 = vrot.slane %v1259_v39, 5  ;;  %v1264_v49 = vrot.slane %v1259_v39, 4  ;;  %v1266_v53 = vrot.slane %v1259_v39, 6  ;;  %v1267_v56 = vrot.slane %v1259_v39, 7 }
0x1b17   :  { %1276 = vrot.lane.b32.xlu2 %v1268_v40, %s1439_s0  ;;  %v1270_v43 = vperm.slane %v1262_v41, 0  ;;  %v1269_v44 = vperm.slane %v1261_v42, 0  ;;  %v1271_v50 = vperm.slane %v1263_v31, 0 }
0x1b18   :  { %v1273_v51 = vperm.slane %v1265_v48, 0  ;;  %v1272_v52 = vperm.slane %v1264_v49, 0  ;;  %v1274_v57 = vperm.slane %v1266_v53, 0  ;;  %v1275_v58 = vperm.slane %v1267_v56, 0 }
0x1b19   :  { %1280 = vrot.lane.b32.xlu1 %v1270_v43, %s1439_s0  ;;  %1278 = vrot.lane.b32.xlu0 %v1269_v44, %s1439_s0 }
0x1b1a   :  { %v1162_v46 = vpop.permute.xlu0 %1161 }
0x1b1b   :  { %1185 = vst.msk [vmem:[%s2213_s3 + $0x3] sm:$0x1] %vm839_vm2, %v1162_v46 }
0x1b1f   :  { %1282 = vrot.lane.b32.xlu2 %v1271_v50, %s1439_s0 }
0x1b21   :  { %1286 = vrot.lane.b32.xlu1 %v1273_v51, %s1439_s0  ;;  %1284 = vrot.lane.b32.xlu0 %v1272_v52, %s1439_s0 }
0x1b22   :  { %v1168_v54 = vpop.permute.xlu0 %1167 }
0x1b23   :  { %1188 = vst.msk [vmem:[%s2213_s3 + $0x1b] sm:$0x1] %vm839_vm2, %v1168_v54 }
0x1b27   :  { %1288 = vrot.lane.b32.xlu2 %v1274_v57, %s1439_s0 }
0x1b29   :  { %1290 = vrot.lane.b32.xlu0 %v1275_v58, %s1439_s0 }
0x1b2a   :  { %v1174_v59 = vpop.permute.xlu0 %1173 }
0x1b2b   :  { %1191 = vst.msk [vmem:[%s2213_s3 + $0x33] sm:$0x1] %vm839_vm2, %v1174_v59 }
0x1b71   :  { %v1277_v61 = vpop.permute.xlu2 %1276 }
0x1b72   :  { %1300 = vst.msk [vmem:[%s2213_s3 + $0x4] sm:$0x1] %vm839_vm2, %v1277_v61 }
0x1b79   :  { %v1283_v62 = vpop.permute.xlu2 %1282 }
0x1b7a   :  { %1303 = vst.msk [vmem:[%s2213_s3 + $0x1c] sm:$0x1] %vm839_vm2, %v1283_v62 }
0x1b81   :  { %v1289_v63 = vpop.permute.xlu2 %1288 }
0x1b82   :  { %1306 = vst.msk [vmem:[%s2213_s3 + $0x34] sm:$0x1] %vm839_vm2, %v1289_v63 }
0x1b8b   :  { %v1281_v4 = vpop.permute.xlu1 %1280  ;;  %v1279_v5 = vpop.permute.xlu0 %1278 }
0x1b8c   :  { %1302 = vst.msk [vmem:[%s2213_s3 + $0x14] sm:$0x1] %vm839_vm2, %v1281_v4 }
0x1b8d   :  { %1301 = vst.msk [vmem:[%s2213_s3 + $0xc] sm:$0x1] %vm839_vm2, %v1279_v5 }
0x1b93   :  { %v1287_v28 = vpop.permute.xlu1 %1286  ;;  %v1285_v6 = vpop.permute.xlu0 %1284 }
0x1b94   :  { %1305 = vst.msk [vmem:[%s2213_s3 + $0x2c] sm:$0x1] %vm839_vm2, %v1287_v28 }
0x1b95   :  { %1304 = vst.msk [vmem:[%s2213_s3 + $0x24] sm:$0x1] %vm839_vm2, %v1285_v6 }
0x1b9b   :  { %v1291_v7 = vpop.permute.xlu0 %1290 }
0x1b9c   :  { %1307 = vst.msk [vmem:[%s2213_s3 + $0x3c] sm:$0x1] %vm839_vm2, %v1291_v7 }

</bundles_post_ra>
